<compile_context>
chip_gen: v7x
topology: tpu7x:2x2x1
jax: 0.10.0
libtpu: 0.0.40
codegen_flags: <defaults>
</compile_context>

<pallas_src>
import functools
import math

import jax
import jax.numpy as jnp
from jax.experimental import pallas as pl
from jax.experimental.pallas import tpu as pltpu

LN_EPS = 1e-12  # HF BertLayerNorm default eps


# ----------------------------------------------------------------------------
# Shared math helpers (used by both the kernel body and the pure-JAX reference)
# ----------------------------------------------------------------------------
def _layernorm(x, g, b):
    mu = jnp.mean(x, axis=-1, keepdims=True)
    var = jnp.mean((x - mu) ** 2, axis=-1, keepdims=True)
    return (x - mu) * jax.lax.rsqrt(var + LN_EPS) * g + b


def _gelu_tanh(x):
    # "gelu_new" (tanh approximation)
    return 0.5 * x * (1.0 + jnp.tanh(0.7978845608028654 * (x + 0.044715 * x * x * x)))


# ----------------------------------------------------------------------------
# Fused BertLayer kernel: one grid step == block_b batch rows.
# ----------------------------------------------------------------------------
def bert_layer_kernel(num_heads, head_dim,
                      x_ref, mask_ref,
                      wq_ref, bq_ref, wk_ref, bk_ref, wv_ref, bv_ref,
                      wo_ref, bo_ref, g1_ref, b1_ref,
                      wi_ref, bi_ref, wo2_ref, bo2_ref, g2_ref, b2_ref,
                      out_ref):
    Bb, S, H = x_ref.shape
    scale = 1.0 / math.sqrt(head_dim)

    x_f32 = x_ref[...].astype(jnp.float32)          # (Bb, S, H) residual path
    x2d = x_f32.reshape(Bb * S, H)                  # fold batch into M
    x_mm = x2d.astype(jnp.bfloat16)                 # MXU input

    # ---- full-width Q/K/V projections (lane-dense bf16 (H,H) weights) ----
    q = jnp.dot(x_mm, wq_ref[...], preferred_element_type=jnp.float32) + bq_ref[...]
    k = jnp.dot(x_mm, wk_ref[...], preferred_element_type=jnp.float32) + bk_ref[...]
    v = jnp.dot(x_mm, wv_ref[...], preferred_element_type=jnp.float32) + bv_ref[...]
    qb = q.astype(jnp.bfloat16).reshape(Bb, S, H)
    kb = k.astype(jnp.bfloat16).reshape(Bb, S, H)
    vb = v.astype(jnp.bfloat16).reshape(Bb, S, H)

    add_mask = mask_ref[...]                        # (Bb, 1, S) additive mask

    # ---- per-head scores / softmax / context (only per-head math left) ----
    ctx_heads = []
    for h in range(num_heads):
        sl = slice(h * head_dim, (h + 1) * head_dim)
        q_h, k_h, v_h = qb[:, :, sl], kb[:, :, sl], vb[:, :, sl]
        s = jnp.einsum('bqd,bkd->bqk', q_h, k_h,
                       preferred_element_type=jnp.float32) * scale
        s = s + add_mask                            # broadcast over query rows
        m = jnp.max(s, axis=-1, keepdims=True)
        p = jnp.exp(s - m)
        inv = pl.reciprocal(jnp.sum(p, axis=-1, keepdims=True), approx=True)
        p = (p * inv).astype(jnp.bfloat16)
        ctx_heads.append(jnp.einsum('bqk,bkd->bqd', p, v_h,
                                    preferred_element_type=jnp.float32))
    ctx = jnp.concatenate(ctx_heads, axis=-1).reshape(Bb * S, H)

    # ---- full-width output projection + add & LayerNorm ----
    attn = jnp.dot(ctx.astype(jnp.bfloat16), wo_ref[...],
                   preferred_element_type=jnp.float32) + bo_ref[...]
    y = _layernorm(attn + x2d, g1_ref[...], b1_ref[...])

    # ---- feed-forward (GELU) + add & LayerNorm ----
    inter = _gelu_tanh(jnp.dot(y.astype(jnp.bfloat16), wi_ref[...],
                               preferred_element_type=jnp.float32) + bi_ref[...])
    ffn = jnp.dot(inter.astype(jnp.bfloat16), wo2_ref[...],
                  preferred_element_type=jnp.float32) + bo2_ref[...]
    out = _layernorm(ffn + y, g2_ref[...], b2_ref[...])

    out_ref[...] = out.reshape(Bb, S, H).astype(out_ref.dtype)


def _pick_block_b(batch, seq, max_rows=512):
    """Largest divisor of `batch` keeping block_b*seq (the matmul M dim) modest."""
    best = 1
    for cand in range(1, batch + 1):
        if batch % cand == 0 and cand * seq <= max_rows:
            best = cand
    return best


def bert_layer_pallas(x, add_mask, params, num_heads, block_b=None):
    """One BertLayer forward. x: (B,S,H) f32, add_mask: (B,1,S) additive."""
    B, S, H = x.shape
    I = params['wi'].shape[1]
    head_dim = H // num_heads
    if block_b is None:
        block_b = _pick_block_b(B, S)
    assert B % block_b == 0

    kernel = functools.partial(bert_layer_kernel, num_heads, head_dim)

    weight_keys = ('wq', 'bq', 'wk', 'bk', 'wv', 'bv', 'wo', 'bo',
                   'g1', 'b1', 'wi', 'bi', 'wo2', 'bo2', 'g2', 'b2')
    weights = [params[k] for k in weight_keys]          # all 2-D, lane-dense

    in_specs = ([pl.BlockSpec((block_b, S, H), lambda b: (b, 0, 0)),
                 pl.BlockSpec((block_b, 1, S), lambda b: (b, 0, 0))]
                + [pl.BlockSpec(w.shape, lambda b: (0, 0)) for w in weights])

    # Advisory cost estimate for XLA scheduling around the custom call.
    flops = int(2 * B * S * H * (3 * H)      # QKV projections
                + 4 * B * S * S * H          # scores + context (summed over heads)
                + 2 * B * S * H * H          # output projection
                + 4 * B * S * H * I)         # FFN (both matmuls)
    transcendentals = int(B * num_heads * S * S + B * S * I + 2 * B * S)
    weight_bytes = sum(int(w.nbytes) for w in weights)
    bytes_accessed = int(2 * x.nbytes + add_mask.nbytes + weight_bytes)

    # VMEM budget: above v5e's 16 MiB scoped default, below v7x's 64 MiB physical.
    block_bytes = block_b * S * (2 * H * 4 + 4)
    vmem_limit = int(min(48 * 1024 * 1024,
                         max(32 * 1024 * 1024, 4 * (weight_bytes + block_bytes))))

    return pl.pallas_call(
        kernel,
        out_shape=jax.ShapeDtypeStruct((B, S, H), x.dtype),
        grid=(B // block_b,),
        in_specs=in_specs,
        out_specs=pl.BlockSpec((block_b, S, H), lambda b: (b, 0, 0)),
        compiler_params=pltpu.CompilerParams(
            dimension_semantics=("parallel",),        # batch rows independent
            vmem_limit_bytes=vmem_limit),
        cost_estimate=pl.CostEstimate(flops=flops,
                                      transcendentals=transcendentals,
                                      bytes_accessed=bytes_accessed),
    )(x, add_mask, *weights)


# ----------------------------------------------------------------------------
# Encoder forward (loop over layers + mixup logic), mirroring the PyTorch
# AlteredBertEncoder.forward control flow.  head_mask / cross-attention are
# None in this setup.  The mixup branch fuses hidden_states and hidden_states2
# into one pallas_call per layer (i <= mixup_layer) by batch concatenation.
# TODO(synk): per-layer attention-prob outputs (output_attentions=True) are
# not emitted by the fused kernel.
# ----------------------------------------------------------------------------
def altered_bert_encoder(layers_params, hidden_states, attention_mask,
                         hidden_states2=None, attention_mask2=None,
                         mixup_lambda=0.0, mixup_layer=-1,
                         output_hidden_states=False, num_heads=4,
                         layer_fn=bert_layer_pallas):
    all_hidden_states = () if output_hidden_states else None
    for i, p in enumerate(layers_params):
        if output_hidden_states:
            all_hidden_states = all_hidden_states + (hidden_states,)
        if mixup_layer != -1 and i <= mixup_layer:
            assert hidden_states2 is not None
            assert attention_mask2 is not None
            B = hidden_states.shape[0]
            fused_x = jnp.concatenate([hidden_states, hidden_states2], axis=0)
            fused_m = jnp.concatenate([attention_mask, attention_mask2], axis=0)
            fused_out = layer_fn(fused_x, fused_m, p, num_heads)
            hidden_states, hidden_states2 = fused_out[:B], fused_out[B:]
            if i == mixup_layer:
                hidden_states = (mixup_lambda * hidden_states
                                 + (1.0 - mixup_lambda) * hidden_states2)
        else:
            hidden_states = layer_fn(hidden_states, attention_mask, p, num_heads)
    if output_hidden_states:
        all_hidden_states = all_hidden_states + (hidden_states,)
    return tuple(v for v in [hidden_states, all_hidden_states] if v is not None)


# ----------------------------------------------------------------------------
# Pure-JAX f32 reference BertLayer (HF-style, un-split weights)
# ----------------------------------------------------------------------------
def bert_layer_ref(x, add_mask, p, num_heads):
    B, S, H = x.shape
    hd = H // num_heads

    def heads(t):
        return t.reshape(B, S, num_heads, hd).transpose(0, 2, 1, 3)

    q = heads(x @ p['wq_full'] + p['bq_full'])
    k = heads(x @ p['wk_full'] + p['bk_full'])
    v = heads(x @ p['wv_full'] + p['bv_full'])
    s = jnp.einsum('bhqd,bhkd->bhqk', q, k) / math.sqrt(hd)
    s = s + add_mask[:, None, :, :]                       # (B,1,1,S)
    a = jax.nn.softmax(s, axis=-1)
    ctx = jnp.einsum('bhqk,bhkd->bhqd', a, v).transpose(0, 2, 1, 3).reshape(B, S, H)
    attn = ctx @ p['wo_full'] + p['bo_full']
    y = _layernorm(attn + x, p['g1'], p['b1'])
    inter = _gelu_tanh(y @ p['wi_full'] + p['bi_full'])
    ffn = inter @ p['wo2_full'] + p['bo2_full']
    return _layernorm(ffn + y, p['g2'], p['b2'])


# ----------------------------------------------------------------------------
# Deterministic parameter init (BERT-style normal(0, 0.02))
# ----------------------------------------------------------------------------
def init_layer_params(key, H, I, num_heads):
    std = 0.02
    ks = jax.random.split(key, 12)

    def n(k, shape):
        return jax.random.normal(k, shape, jnp.float32) * std

    wq, wk, wv, wo = n(ks[0], (H, H)), n(ks[1], (H, H)), n(ks[2], (H, H)), n(ks[3], (H, H))
    bq, bk, bv, bo = n(ks[4], (H,)), n(ks[5], (H,)), n(ks[6], (H,)), n(ks[7], (H,))
    wi, bi = n(ks[8], (H, I)), n(ks[9], (I,))
    wo2, bo2 = n(ks[10], (I, H)), n(ks[11], (H,))

    ones_h = jnp.ones((1, H), jnp.float32)
    zeros_h = jnp.zeros((1, H), jnp.float32)

    return dict(
        # full f32 matrices used by the pure-JAX reference
        wq_full=wq, bq_full=bq, wk_full=wk, bk_full=bk, wv_full=wv, bv_full=bv,
        wo_full=wo, bo_full=bo, wi_full=wi, bi_full=bi, wo2_full=wo2, bo2_full=bo2,
        # lane-dense bf16 MXU weights + f32 vector params for the Pallas kernel
        wq=wq.astype(jnp.bfloat16), wk=wk.astype(jnp.bfloat16),
        wv=wv.astype(jnp.bfloat16), wo=wo.astype(jnp.bfloat16),
        wi=wi.astype(jnp.bfloat16), wo2=wo2.astype(jnp.bfloat16),
        bq=bq.reshape(1, H), bk=bk.reshape(1, H), bv=bv.reshape(1, H),
        bo=bo.reshape(1, H), bi=bi.reshape(1, I), bo2=bo2.reshape(1, H),
        g1=ones_h, b1=zeros_h, g2=ones_h, b2=zeros_h,
    )


if __name__ == "__main__":
    # Synthetic BERT config: 2 layers, hidden=32, 4 heads, intermediate=64,
    # batch=2, seq=8, hidden_act="gelu_new".
    B, S, H, NH, I, L = 2, 8, 32, 4, 64, 2

    key = jax.random.PRNGKey(0)
    k_x, k_x2, k_layers = jax.random.split(key, 3)

    hidden_states = jax.random.normal(k_x, (B, S, H), jnp.float32)
    hidden_states2 = jax.random.normal(k_x2, (B, S, H), jnp.float32)

    # Binary masks -> HF-style additive extended masks (B, 1, S)
    attn_mask = jnp.ones((B, S), jnp.float32).at[:, -2:].set(0.0)   # last 2 tokens padded
    attn_mask2 = jnp.ones((B, S), jnp.float32)
    add_mask = ((1.0 - attn_mask) * -10000.0)[:, None, :]
    add_mask2 = ((1.0 - attn_mask2) * -10000.0)[:, None, :]

    layer_keys = jax.random.split(k_layers, L)
    layers_params = [init_layer_params(layer_keys[i], H, I, NH) for i in range(L)]

    mixup_lambda, mixup_layer = 0.3, 0

    # Pallas-kernel encoder
    out = altered_bert_encoder(layers_params, hidden_states, add_mask,
                               hidden_states2=hidden_states2,
                               attention_mask2=add_mask2,
                               mixup_lambda=mixup_lambda, mixup_layer=mixup_layer,
                               num_heads=NH, layer_fn=bert_layer_pallas)
    last_hidden = out[0]
    jax.block_until_ready(last_hidden)

    # Pure-JAX f32 reference for correctness (kernel uses bf16 matmul inputs
    # and an approximate softmax reciprocal, so compare with a bf16-level
    # tolerance rather than exact f32).
    ref_out = altered_bert_encoder(layers_params, hidden_states, add_mask,
                                   hidden_states2=hidden_states2,
                                   attention_mask2=add_mask2,
                                   mixup_lambda=mixup_lambda, mixup_layer=mixup_layer,
                                   num_heads=NH, layer_fn=bert_layer_ref)
    max_diff = float(jnp.max(jnp.abs(last_hidden - ref_out[0])))
    assert max_diff < 3e-2, f"mismatch vs reference: {max_diff}"

    print("KERNEL_OK")
</pallas_src>

<mosaic_0001>
module attributes {stable_mosaic.version = 11 : i64} {
  func.func @bert_layer_kernel(%arg0: i32, %arg1: memref<4x8x32xf32, #tpu.memory_space<vmem>>, %arg2: memref<4x1x8xf32, #tpu.memory_space<vmem>>, %arg3: memref<32x32xbf16, #tpu.memory_space<vmem>>, %arg4: memref<1x32xf32, #tpu.memory_space<vmem>>, %arg5: memref<32x32xbf16, #tpu.memory_space<vmem>>, %arg6: memref<1x32xf32, #tpu.memory_space<vmem>>, %arg7: memref<32x32xbf16, #tpu.memory_space<vmem>>, %arg8: memref<1x32xf32, #tpu.memory_space<vmem>>, %arg9: memref<32x32xbf16, #tpu.memory_space<vmem>>, %arg10: memref<1x32xf32, #tpu.memory_space<vmem>>, %arg11: memref<1x32xf32, #tpu.memory_space<vmem>>, %arg12: memref<1x32xf32, #tpu.memory_space<vmem>>, %arg13: memref<32x64xbf16, #tpu.memory_space<vmem>>, %arg14: memref<1x64xf32, #tpu.memory_space<vmem>>, %arg15: memref<64x32xbf16, #tpu.memory_space<vmem>>, %arg16: memref<1x32xf32, #tpu.memory_space<vmem>>, %arg17: memref<1x32xf32, #tpu.memory_space<vmem>>, %arg18: memref<1x32xf32, #tpu.memory_space<vmem>>, %arg19: memref<4x8x32xf32, #tpu.memory_space<vmem>>) attributes {dimension_semantics = [#tpu.dimension_semantics<parallel>], iteration_bounds = array<i64: 1>, scalar_prefetch = 0 : i64, scratch_operands = 0 : i64, tpu.core_type = #tpu.core_type<tc>, window_params = [{transform_indices = @transform_0, window_bounds = array<i64: 4, 8, 32>}, {transform_indices = @transform_1, window_bounds = array<i64: 4, 1, 8>}, {pipeline_mode = #tpu.pipeline_mode<synchronous>, transform_indices = @transform_2, window_bounds = array<i64: 32, 32>}, {pipeline_mode = #tpu.pipeline_mode<synchronous>, transform_indices = @transform_3, window_bounds = array<i64: 1, 32>}, {pipeline_mode = #tpu.pipeline_mode<synchronous>, transform_indices = @transform_4, window_bounds = array<i64: 32, 32>}, {pipeline_mode = #tpu.pipeline_mode<synchronous>, transform_indices = @transform_5, window_bounds = array<i64: 1, 32>}, {pipeline_mode = #tpu.pipeline_mode<synchronous>, transform_indices = @transform_6, window_bounds = array<i64: 32, 32>}, {pipeline_mode = #tpu.pipeline_mode<synchronous>, transform_indices = @transform_7, window_bounds = array<i64: 1, 32>}, {pipeline_mode = #tpu.pipeline_mode<synchronous>, transform_indices = @transform_8, window_bounds = array<i64: 32, 32>}, {pipeline_mode = #tpu.pipeline_mode<synchronous>, transform_indices = @transform_9, window_bounds = array<i64: 1, 32>}, {pipeline_mode = #tpu.pipeline_mode<synchronous>, transform_indices = @transform_10, window_bounds = array<i64: 1, 32>}, {pipeline_mode = #tpu.pipeline_mode<synchronous>, transform_indices = @transform_11, window_bounds = array<i64: 1, 32>}, {pipeline_mode = #tpu.pipeline_mode<synchronous>, transform_indices = @transform_12, window_bounds = array<i64: 32, 64>}, {pipeline_mode = #tpu.pipeline_mode<synchronous>, transform_indices = @transform_13, window_bounds = array<i64: 1, 64>}, {pipeline_mode = #tpu.pipeline_mode<synchronous>, transform_indices = @transform_14, window_bounds = array<i64: 64, 32>}, {pipeline_mode = #tpu.pipeline_mode<synchronous>, transform_indices = @transform_15, window_bounds = array<i64: 1, 32>}, {pipeline_mode = #tpu.pipeline_mode<synchronous>, transform_indices = @transform_16, window_bounds = array<i64: 1, 32>}, {pipeline_mode = #tpu.pipeline_mode<synchronous>, transform_indices = @transform_17, window_bounds = array<i64: 1, 32>}, {transform_indices = @transform_18, window_bounds = array<i64: 4, 8, 32>}]} {
    %c0 = arith.constant 0 : index
    %c0_0 = arith.constant 0 : index
    %c0_1 = arith.constant 0 : index
    %0 = vector.load %arg1[%c0, %c0_0, %c0_1] : memref<4x8x32xf32, #tpu.memory_space<vmem>>, vector<4x8x32xf32>
    %1 = vector.shape_cast %0 : vector<4x8x32xf32> to vector<32x32xf32>
    %2 = arith.truncf %1 : vector<32x32xf32> to vector<32x32xbf16>
    %c0_2 = arith.constant 0 : index
    %c0_3 = arith.constant 0 : index
    %3 = vector.load %arg3[%c0_2, %c0_3] : memref<32x32xbf16, #tpu.memory_space<vmem>>, vector<32x32xbf16>
    %cst = arith.constant dense<0.000000e+00> : vector<32x32xf32>
    %4 = tpu.matmul %2, %3, %cst {dimension_numbers = #tpu.dot_dimension_numbers<[1], [0], [0], [1], [0, 0, 1, 1], [], []>} : vector<32x32xbf16>, vector<32x32xbf16>, vector<32x32xf32> -> vector<32x32xf32>
    %c0_4 = arith.constant 0 : index
    %c0_5 = arith.constant 0 : index
    %5 = vector.load %arg4[%c0_4, %c0_5] : memref<1x32xf32, #tpu.memory_space<vmem>>, vector<1x32xf32>
    %6 = vector.broadcast %5 : vector<1x32xf32> to vector<32x32xf32>
    %7 = arith.addf %4, %6 : vector<32x32xf32>
    %c0_6 = arith.constant 0 : index
    %c0_7 = arith.constant 0 : index
    %8 = vector.load %arg5[%c0_6, %c0_7] : memref<32x32xbf16, #tpu.memory_space<vmem>>, vector<32x32xbf16>
    %cst_8 = arith.constant dense<0.000000e+00> : vector<32x32xf32>
    %9 = tpu.matmul %2, %8, %cst_8 {dimension_numbers = #tpu.dot_dimension_numbers<[1], [0], [0], [1], [0, 0, 1, 1], [], []>} : vector<32x32xbf16>, vector<32x32xbf16>, vector<32x32xf32> -> vector<32x32xf32>
    %c0_9 = arith.constant 0 : index
    %c0_10 = arith.constant 0 : index
    %10 = vector.load %arg6[%c0_9, %c0_10] : memref<1x32xf32, #tpu.memory_space<vmem>>, vector<1x32xf32>
    %11 = vector.broadcast %10 : vector<1x32xf32> to vector<32x32xf32>
    %12 = arith.addf %9, %11 : vector<32x32xf32>
    %c0_11 = arith.constant 0 : index
    %c0_12 = arith.constant 0 : index
    %13 = vector.load %arg7[%c0_11, %c0_12] : memref<32x32xbf16, #tpu.memory_space<vmem>>, vector<32x32xbf16>
    %cst_13 = arith.constant dense<0.000000e+00> : vector<32x32xf32>
    %14 = tpu.matmul %2, %13, %cst_13 {dimension_numbers = #tpu.dot_dimension_numbers<[1], [0], [0], [1], [0, 0, 1, 1], [], []>} : vector<32x32xbf16>, vector<32x32xbf16>, vector<32x32xf32> -> vector<32x32xf32>
    %c0_14 = arith.constant 0 : index
    %c0_15 = arith.constant 0 : index
    %15 = vector.load %arg8[%c0_14, %c0_15] : memref<1x32xf32, #tpu.memory_space<vmem>>, vector<1x32xf32>
    %16 = vector.broadcast %15 : vector<1x32xf32> to vector<32x32xf32>
    %17 = arith.addf %14, %16 : vector<32x32xf32>
    %18 = arith.truncf %7 : vector<32x32xf32> to vector<32x32xbf16>
    %19 = vector.shape_cast %18 : vector<32x32xbf16> to vector<4x8x32xbf16>
    %20 = arith.truncf %12 : vector<32x32xf32> to vector<32x32xbf16>
    %21 = vector.shape_cast %20 : vector<32x32xbf16> to vector<4x8x32xbf16>
    %22 = arith.truncf %17 : vector<32x32xf32> to vector<32x32xbf16>
    %23 = vector.shape_cast %22 : vector<32x32xbf16> to vector<4x8x32xbf16>
    %c0_16 = arith.constant 0 : index
    %c0_17 = arith.constant 0 : index
    %c0_18 = arith.constant 0 : index
    %24 = vector.load %arg2[%c0_16, %c0_17, %c0_18] : memref<4x1x8xf32, #tpu.memory_space<vmem>>, vector<4x1x8xf32>
    %25 = vector.extract_strided_slice %19 {offsets = [0, 0, 0], sizes = [4, 8, 8], strides = [1, 1, 1]} : vector<4x8x32xbf16> to vector<4x8x8xbf16>
    %26 = vector.extract_strided_slice %21 {offsets = [0, 0, 0], sizes = [4, 8, 8], strides = [1, 1, 1]} : vector<4x8x32xbf16> to vector<4x8x8xbf16>
    %27 = vector.extract_strided_slice %23 {offsets = [0, 0, 0], sizes = [4, 8, 8], strides = [1, 1, 1]} : vector<4x8x32xbf16> to vector<4x8x8xbf16>
    "tpu.trace_start"() <{level = 10 : i32, message = "bqd,bkd->bqk"}> : () -> ()
    %cst_19 = arith.constant dense<0.000000e+00> : vector<4x8x8xf32>
    %28 = tpu.matmul %25, %26, %cst_19 {dimension_numbers = #tpu.dot_dimension_numbers<[2], [2], [1], [1], [0, 0, 0, 1, 1, 1], [0], [0]>} : vector<4x8x8xbf16>, vector<4x8x8xbf16>, vector<4x8x8xf32> -> vector<4x8x8xf32>
    "tpu.trace_stop"() : () -> ()
    %cst_20 = arith.constant 0.353553385 : f32
    %29 = vector.broadcast %cst_20 : f32 to vector<4x8x8xf32>
    %30 = arith.mulf %28, %29 : vector<4x8x8xf32>
    %31 = vector.broadcast %24 : vector<4x1x8xf32> to vector<4x8x8xf32>
    %32 = arith.addf %30, %31 : vector<4x8x8xf32>
    %cst_21 = arith.constant dense<0xFF800000> : vector<4x8xf32>
    %33 = vector.multi_reduction <maximumf>, %32, %cst_21 [2] : vector<4x8x8xf32> to vector<4x8xf32>
    %34 = vector.shape_cast %33 : vector<4x8xf32> to vector<4x8x1xf32>
    %35 = vector.broadcast %34 : vector<4x8x1xf32> to vector<4x8x8xf32>
    %36 = arith.subf %32, %35 : vector<4x8x8xf32>
    %37 = math.exp %36 : vector<4x8x8xf32>
    %cst_22 = arith.constant dense<0.000000e+00> : vector<4x8xf32>
    %38 = vector.multi_reduction <add>, %37, %cst_22 [2] : vector<4x8x8xf32> to vector<4x8xf32>
    %39 = vector.shape_cast %38 : vector<4x8xf32> to vector<4x8x1xf32>
    %40 = tpu.reciprocal %39 {approx = true} : vector<4x8x1xf32> -> vector<4x8x1xf32>
    %41 = vector.broadcast %40 : vector<4x8x1xf32> to vector<4x8x8xf32>
    %42 = arith.mulf %37, %41 : vector<4x8x8xf32>
    %43 = arith.truncf %42 : vector<4x8x8xf32> to vector<4x8x8xbf16>
    "tpu.trace_start"() <{level = 10 : i32, message = "bqk,bkd->bqd"}> : () -> ()
    %cst_23 = arith.constant dense<0.000000e+00> : vector<4x8x8xf32>
    %44 = tpu.matmul %43, %27, %cst_23 {dimension_numbers = #tpu.dot_dimension_numbers<[2], [1], [1], [2], [0, 0, 0, 1, 1, 2], [0], [0]>} : vector<4x8x8xbf16>, vector<4x8x8xbf16>, vector<4x8x8xf32> -> vector<4x8x8xf32>
    "tpu.trace_stop"() : () -> ()
    %45 = vector.extract_strided_slice %19 {offsets = [0, 0, 8], sizes = [4, 8, 8], strides = [1, 1, 1]} : vector<4x8x32xbf16> to vector<4x8x8xbf16>
    %46 = vector.extract_strided_slice %21 {offsets = [0, 0, 8], sizes = [4, 8, 8], strides = [1, 1, 1]} : vector<4x8x32xbf16> to vector<4x8x8xbf16>
    %47 = vector.extract_strided_slice %23 {offsets = [0, 0, 8], sizes = [4, 8, 8], strides = [1, 1, 1]} : vector<4x8x32xbf16> to vector<4x8x8xbf16>
    "tpu.trace_start"() <{level = 10 : i32, message = "bqd,bkd->bqk"}> : () -> ()
    %cst_24 = arith.constant dense<0.000000e+00> : vector<4x8x8xf32>
    %48 = tpu.matmul %45, %46, %cst_24 {dimension_numbers = #tpu.dot_dimension_numbers<[2], [2], [1], [1], [0, 0, 0, 1, 1, 1], [0], [0]>} : vector<4x8x8xbf16>, vector<4x8x8xbf16>, vector<4x8x8xf32> -> vector<4x8x8xf32>
    "tpu.trace_stop"() : () -> ()
    %cst_25 = arith.constant 0.353553385 : f32
    %49 = vector.broadcast %cst_25 : f32 to vector<4x8x8xf32>
    %50 = arith.mulf %48, %49 : vector<4x8x8xf32>
    %51 = vector.broadcast %24 : vector<4x1x8xf32> to vector<4x8x8xf32>
    %52 = arith.addf %50, %51 : vector<4x8x8xf32>
    %cst_26 = arith.constant dense<0xFF800000> : vector<4x8xf32>
    %53 = vector.multi_reduction <maximumf>, %52, %cst_26 [2] : vector<4x8x8xf32> to vector<4x8xf32>
    %54 = vector.shape_cast %53 : vector<4x8xf32> to vector<4x8x1xf32>
    %55 = vector.broadcast %54 : vector<4x8x1xf32> to vector<4x8x8xf32>
    %56 = arith.subf %52, %55 : vector<4x8x8xf32>
    %57 = math.exp %56 : vector<4x8x8xf32>
    %cst_27 = arith.constant dense<0.000000e+00> : vector<4x8xf32>
    %58 = vector.multi_reduction <add>, %57, %cst_27 [2] : vector<4x8x8xf32> to vector<4x8xf32>
    %59 = vector.shape_cast %58 : vector<4x8xf32> to vector<4x8x1xf32>
    %60 = tpu.reciprocal %59 {approx = true} : vector<4x8x1xf32> -> vector<4x8x1xf32>
    %61 = vector.broadcast %60 : vector<4x8x1xf32> to vector<4x8x8xf32>
    %62 = arith.mulf %57, %61 : vector<4x8x8xf32>
    %63 = arith.truncf %62 : vector<4x8x8xf32> to vector<4x8x8xbf16>
    "tpu.trace_start"() <{level = 10 : i32, message = "bqk,bkd->bqd"}> : () -> ()
    %cst_28 = arith.constant dense<0.000000e+00> : vector<4x8x8xf32>
    %64 = tpu.matmul %63, %47, %cst_28 {dimension_numbers = #tpu.dot_dimension_numbers<[2], [1], [1], [2], [0, 0, 0, 1, 1, 2], [0], [0]>} : vector<4x8x8xbf16>, vector<4x8x8xbf16>, vector<4x8x8xf32> -> vector<4x8x8xf32>
    "tpu.trace_stop"() : () -> ()
    %65 = vector.extract_strided_slice %19 {offsets = [0, 0, 16], sizes = [4, 8, 8], strides = [1, 1, 1]} : vector<4x8x32xbf16> to vector<4x8x8xbf16>
    %66 = vector.extract_strided_slice %21 {offsets = [0, 0, 16], sizes = [4, 8, 8], strides = [1, 1, 1]} : vector<4x8x32xbf16> to vector<4x8x8xbf16>
    %67 = vector.extract_strided_slice %23 {offsets = [0, 0, 16], sizes = [4, 8, 8], strides = [1, 1, 1]} : vector<4x8x32xbf16> to vector<4x8x8xbf16>
    "tpu.trace_start"() <{level = 10 : i32, message = "bqd,bkd->bqk"}> : () -> ()
    %cst_29 = arith.constant dense<0.000000e+00> : vector<4x8x8xf32>
    %68 = tpu.matmul %65, %66, %cst_29 {dimension_numbers = #tpu.dot_dimension_numbers<[2], [2], [1], [1], [0, 0, 0, 1, 1, 1], [0], [0]>} : vector<4x8x8xbf16>, vector<4x8x8xbf16>, vector<4x8x8xf32> -> vector<4x8x8xf32>
    "tpu.trace_stop"() : () -> ()
    %cst_30 = arith.constant 0.353553385 : f32
    %69 = vector.broadcast %cst_30 : f32 to vector<4x8x8xf32>
    %70 = arith.mulf %68, %69 : vector<4x8x8xf32>
    %71 = vector.broadcast %24 : vector<4x1x8xf32> to vector<4x8x8xf32>
    %72 = arith.addf %70, %71 : vector<4x8x8xf32>
    %cst_31 = arith.constant dense<0xFF800000> : vector<4x8xf32>
    %73 = vector.multi_reduction <maximumf>, %72, %cst_31 [2] : vector<4x8x8xf32> to vector<4x8xf32>
    %74 = vector.shape_cast %73 : vector<4x8xf32> to vector<4x8x1xf32>
    %75 = vector.broadcast %74 : vector<4x8x1xf32> to vector<4x8x8xf32>
    %76 = arith.subf %72, %75 : vector<4x8x8xf32>
    %77 = math.exp %76 : vector<4x8x8xf32>
    %cst_32 = arith.constant dense<0.000000e+00> : vector<4x8xf32>
    %78 = vector.multi_reduction <add>, %77, %cst_32 [2] : vector<4x8x8xf32> to vector<4x8xf32>
    %79 = vector.shape_cast %78 : vector<4x8xf32> to vector<4x8x1xf32>
    %80 = tpu.reciprocal %79 {approx = true} : vector<4x8x1xf32> -> vector<4x8x1xf32>
    %81 = vector.broadcast %80 : vector<4x8x1xf32> to vector<4x8x8xf32>
    %82 = arith.mulf %77, %81 : vector<4x8x8xf32>
    %83 = arith.truncf %82 : vector<4x8x8xf32> to vector<4x8x8xbf16>
    "tpu.trace_start"() <{level = 10 : i32, message = "bqk,bkd->bqd"}> : () -> ()
    %cst_33 = arith.constant dense<0.000000e+00> : vector<4x8x8xf32>
    %84 = tpu.matmul %83, %67, %cst_33 {dimension_numbers = #tpu.dot_dimension_numbers<[2], [1], [1], [2], [0, 0, 0, 1, 1, 2], [0], [0]>} : vector<4x8x8xbf16>, vector<4x8x8xbf16>, vector<4x8x8xf32> -> vector<4x8x8xf32>
    "tpu.trace_stop"() : () -> ()
    %85 = vector.extract_strided_slice %19 {offsets = [0, 0, 24], sizes = [4, 8, 8], strides = [1, 1, 1]} : vector<4x8x32xbf16> to vector<4x8x8xbf16>
    %86 = vector.extract_strided_slice %21 {offsets = [0, 0, 24], sizes = [4, 8, 8], strides = [1, 1, 1]} : vector<4x8x32xbf16> to vector<4x8x8xbf16>
    %87 = vector.extract_strided_slice %23 {offsets = [0, 0, 24], sizes = [4, 8, 8], strides = [1, 1, 1]} : vector<4x8x32xbf16> to vector<4x8x8xbf16>
    "tpu.trace_start"() <{level = 10 : i32, message = "bqd,bkd->bqk"}> : () -> ()
    %cst_34 = arith.constant dense<0.000000e+00> : vector<4x8x8xf32>
    %88 = tpu.matmul %85, %86, %cst_34 {dimension_numbers = #tpu.dot_dimension_numbers<[2], [2], [1], [1], [0, 0, 0, 1, 1, 1], [0], [0]>} : vector<4x8x8xbf16>, vector<4x8x8xbf16>, vector<4x8x8xf32> -> vector<4x8x8xf32>
    "tpu.trace_stop"() : () -> ()
    %cst_35 = arith.constant 0.353553385 : f32
    %89 = vector.broadcast %cst_35 : f32 to vector<4x8x8xf32>
    %90 = arith.mulf %88, %89 : vector<4x8x8xf32>
    %91 = vector.broadcast %24 : vector<4x1x8xf32> to vector<4x8x8xf32>
    %92 = arith.addf %90, %91 : vector<4x8x8xf32>
    %cst_36 = arith.constant dense<0xFF800000> : vector<4x8xf32>
    %93 = vector.multi_reduction <maximumf>, %92, %cst_36 [2] : vector<4x8x8xf32> to vector<4x8xf32>
    %94 = vector.shape_cast %93 : vector<4x8xf32> to vector<4x8x1xf32>
    %95 = vector.broadcast %94 : vector<4x8x1xf32> to vector<4x8x8xf32>
    %96 = arith.subf %92, %95 : vector<4x8x8xf32>
    %97 = math.exp %96 : vector<4x8x8xf32>
    %cst_37 = arith.constant dense<0.000000e+00> : vector<4x8xf32>
    %98 = vector.multi_reduction <add>, %97, %cst_37 [2] : vector<4x8x8xf32> to vector<4x8xf32>
    %99 = vector.shape_cast %98 : vector<4x8xf32> to vector<4x8x1xf32>
    %100 = tpu.reciprocal %99 {approx = true} : vector<4x8x1xf32> -> vector<4x8x1xf32>
    %101 = vector.broadcast %100 : vector<4x8x1xf32> to vector<4x8x8xf32>
    %102 = arith.mulf %97, %101 : vector<4x8x8xf32>
    %103 = arith.truncf %102 : vector<4x8x8xf32> to vector<4x8x8xbf16>
    "tpu.trace_start"() <{level = 10 : i32, message = "bqk,bkd->bqd"}> : () -> ()
    %cst_38 = arith.constant dense<0.000000e+00> : vector<4x8x8xf32>
    %104 = tpu.matmul %103, %87, %cst_38 {dimension_numbers = #tpu.dot_dimension_numbers<[2], [1], [1], [2], [0, 0, 0, 1, 1, 2], [0], [0]>} : vector<4x8x8xbf16>, vector<4x8x8xbf16>, vector<4x8x8xf32> -> vector<4x8x8xf32>
    "tpu.trace_stop"() : () -> ()
    %105 = tpu.concatenate %44, %64, %84, %104 in 2 : vector<4x8x8xf32>, vector<4x8x8xf32>, vector<4x8x8xf32>, vector<4x8x8xf32> -> vector<4x8x32xf32>
    %106 = vector.shape_cast %105 : vector<4x8x32xf32> to vector<32x32xf32>
    %107 = arith.truncf %106 : vector<32x32xf32> to vector<32x32xbf16>
    %c0_39 = arith.constant 0 : index
    %c0_40 = arith.constant 0 : index
    %108 = vector.load %arg9[%c0_39, %c0_40] : memref<32x32xbf16, #tpu.memory_space<vmem>>, vector<32x32xbf16>
    %cst_41 = arith.constant dense<0.000000e+00> : vector<32x32xf32>
    %109 = tpu.matmul %107, %108, %cst_41 {dimension_numbers = #tpu.dot_dimension_numbers<[1], [0], [0], [1], [0, 0, 1, 1], [], []>} : vector<32x32xbf16>, vector<32x32xbf16>, vector<32x32xf32> -> vector<32x32xf32>
    %c0_42 = arith.constant 0 : index
    %c0_43 = arith.constant 0 : index
    %110 = vector.load %arg10[%c0_42, %c0_43] : memref<1x32xf32, #tpu.memory_space<vmem>>, vector<1x32xf32>
    %111 = vector.broadcast %110 : vector<1x32xf32> to vector<32x32xf32>
    %112 = arith.addf %109, %111 : vector<32x32xf32>
    %113 = arith.addf %112, %1 : vector<32x32xf32>
    %c0_44 = arith.constant 0 : index
    %c0_45 = arith.constant 0 : index
    %114 = vector.load %arg11[%c0_44, %c0_45] : memref<1x32xf32, #tpu.memory_space<vmem>>, vector<1x32xf32>
    %c0_46 = arith.constant 0 : index
    %c0_47 = arith.constant 0 : index
    %115 = vector.load %arg12[%c0_46, %c0_47] : memref<1x32xf32, #tpu.memory_space<vmem>>, vector<1x32xf32>
    %cst_48 = arith.constant dense<0.000000e+00> : vector<32xf32>
    %116 = vector.multi_reduction <add>, %113, %cst_48 [1] : vector<32x32xf32> to vector<32xf32>
    %117 = vector.shape_cast %116 : vector<32xf32> to vector<32x1xf32>
    %cst_49 = arith.constant 3.200000e+01 : f32
    %118 = vector.broadcast %cst_49 : f32 to vector<32x1xf32>
    %119 = arith.divf %117, %118 : vector<32x1xf32>
    %120 = vector.broadcast %119 : vector<32x1xf32> to vector<32x32xf32>
    %121 = arith.subf %113, %120 : vector<32x32xf32>
    %122 = arith.mulf %121, %121 : vector<32x32xf32>
    %cst_50 = arith.constant dense<0.000000e+00> : vector<32xf32>
    %123 = vector.multi_reduction <add>, %122, %cst_50 [1] : vector<32x32xf32> to vector<32xf32>
    %124 = vector.shape_cast %123 : vector<32xf32> to vector<32x1xf32>
    %cst_51 = arith.constant 3.200000e+01 : f32
    %125 = vector.broadcast %cst_51 : f32 to vector<32x1xf32>
    %126 = arith.divf %124, %125 : vector<32x1xf32>
    %127 = vector.broadcast %119 : vector<32x1xf32> to vector<32x32xf32>
    %128 = arith.subf %113, %127 : vector<32x32xf32>
    %cst_52 = arith.constant 9.99999996E-13 : f32
    %129 = vector.broadcast %cst_52 : f32 to vector<32x1xf32>
    %130 = arith.addf %126, %129 : vector<32x1xf32>
    %131 = math.rsqrt %130 : vector<32x1xf32>
    %132 = vector.broadcast %131 : vector<32x1xf32> to vector<32x32xf32>
    %133 = arith.mulf %128, %132 : vector<32x32xf32>
    %134 = vector.broadcast %114 : vector<1x32xf32> to vector<32x32xf32>
    %135 = arith.mulf %133, %134 : vector<32x32xf32>
    %136 = vector.broadcast %115 : vector<1x32xf32> to vector<32x32xf32>
    %137 = arith.addf %135, %136 : vector<32x32xf32>
    %138 = arith.truncf %137 : vector<32x32xf32> to vector<32x32xbf16>
    %c0_53 = arith.constant 0 : index
    %c0_54 = arith.constant 0 : index
    %139 = vector.load %arg13[%c0_53, %c0_54] : memref<32x64xbf16, #tpu.memory_space<vmem>>, vector<32x64xbf16>
    %cst_55 = arith.constant dense<0.000000e+00> : vector<32x64xf32>
    %140 = tpu.matmul %138, %139, %cst_55 {dimension_numbers = #tpu.dot_dimension_numbers<[1], [0], [0], [1], [0, 0, 1, 1], [], []>} : vector<32x32xbf16>, vector<32x64xbf16>, vector<32x64xf32> -> vector<32x64xf32>
    %c0_56 = arith.constant 0 : index
    %c0_57 = arith.constant 0 : index
    %141 = vector.load %arg14[%c0_56, %c0_57] : memref<1x64xf32, #tpu.memory_space<vmem>>, vector<1x64xf32>
    %142 = vector.broadcast %141 : vector<1x64xf32> to vector<32x64xf32>
    %143 = arith.addf %140, %142 : vector<32x64xf32>
    %cst_58 = arith.constant 5.000000e-01 : f32
    %144 = vector.broadcast %cst_58 : f32 to vector<32x64xf32>
    %145 = arith.mulf %144, %143 : vector<32x64xf32>
    %cst_59 = arith.constant 4.471500e-02 : f32
    %146 = vector.broadcast %cst_59 : f32 to vector<32x64xf32>
    %147 = arith.mulf %146, %143 : vector<32x64xf32>
    %148 = arith.mulf %147, %143 : vector<32x64xf32>
    %149 = arith.mulf %148, %143 : vector<32x64xf32>
    %150 = arith.addf %143, %149 : vector<32x64xf32>
    %cst_60 = arith.constant 0.797884583 : f32
    %151 = vector.broadcast %cst_60 : f32 to vector<32x64xf32>
    %152 = arith.mulf %151, %150 : vector<32x64xf32>
    %153 = math.tanh %152 : vector<32x64xf32>
    %cst_61 = arith.constant 1.000000e+00 : f32
    %154 = vector.broadcast %cst_61 : f32 to vector<32x64xf32>
    %155 = arith.addf %154, %153 : vector<32x64xf32>
    %156 = arith.mulf %145, %155 : vector<32x64xf32>
    %157 = arith.truncf %156 : vector<32x64xf32> to vector<32x64xbf16>
    %c0_62 = arith.constant 0 : index
    %c0_63 = arith.constant 0 : index
    %158 = vector.load %arg15[%c0_62, %c0_63] : memref<64x32xbf16, #tpu.memory_space<vmem>>, vector<64x32xbf16>
    %cst_64 = arith.constant dense<0.000000e+00> : vector<32x32xf32>
    %159 = tpu.matmul %157, %158, %cst_64 {dimension_numbers = #tpu.dot_dimension_numbers<[1], [0], [0], [1], [0, 0, 1, 1], [], []>} : vector<32x64xbf16>, vector<64x32xbf16>, vector<32x32xf32> -> vector<32x32xf32>
    %c0_65 = arith.constant 0 : index
    %c0_66 = arith.constant 0 : index
    %160 = vector.load %arg16[%c0_65, %c0_66] : memref<1x32xf32, #tpu.memory_space<vmem>>, vector<1x32xf32>
    %161 = vector.broadcast %160 : vector<1x32xf32> to vector<32x32xf32>
    %162 = arith.addf %159, %161 : vector<32x32xf32>
    %163 = arith.addf %162, %137 : vector<32x32xf32>
    %c0_67 = arith.constant 0 : index
    %c0_68 = arith.constant 0 : index
    %164 = vector.load %arg17[%c0_67, %c0_68] : memref<1x32xf32, #tpu.memory_space<vmem>>, vector<1x32xf32>
    %c0_69 = arith.constant 0 : index
    %c0_70 = arith.constant 0 : index
    %165 = vector.load %arg18[%c0_69, %c0_70] : memref<1x32xf32, #tpu.memory_space<vmem>>, vector<1x32xf32>
    %cst_71 = arith.constant dense<0.000000e+00> : vector<32xf32>
    %166 = vector.multi_reduction <add>, %163, %cst_71 [1] : vector<32x32xf32> to vector<32xf32>
    %167 = vector.shape_cast %166 : vector<32xf32> to vector<32x1xf32>
    %cst_72 = arith.constant 3.200000e+01 : f32
    %168 = vector.broadcast %cst_72 : f32 to vector<32x1xf32>
    %169 = arith.divf %167, %168 : vector<32x1xf32>
    %170 = vector.broadcast %169 : vector<32x1xf32> to vector<32x32xf32>
    %171 = arith.subf %163, %170 : vector<32x32xf32>
    %172 = arith.mulf %171, %171 : vector<32x32xf32>
    %cst_73 = arith.constant dense<0.000000e+00> : vector<32xf32>
    %173 = vector.multi_reduction <add>, %172, %cst_73 [1] : vector<32x32xf32> to vector<32xf32>
    %174 = vector.shape_cast %173 : vector<32xf32> to vector<32x1xf32>
    %cst_74 = arith.constant 3.200000e+01 : f32
    %175 = vector.broadcast %cst_74 : f32 to vector<32x1xf32>
    %176 = arith.divf %174, %175 : vector<32x1xf32>
    %177 = vector.broadcast %169 : vector<32x1xf32> to vector<32x32xf32>
    %178 = arith.subf %163, %177 : vector<32x32xf32>
    %cst_75 = arith.constant 9.99999996E-13 : f32
    %179 = vector.broadcast %cst_75 : f32 to vector<32x1xf32>
    %180 = arith.addf %176, %179 : vector<32x1xf32>
    %181 = math.rsqrt %180 : vector<32x1xf32>
    %182 = vector.broadcast %181 : vector<32x1xf32> to vector<32x32xf32>
    %183 = arith.mulf %178, %182 : vector<32x32xf32>
    %184 = vector.broadcast %164 : vector<1x32xf32> to vector<32x32xf32>
    %185 = arith.mulf %183, %184 : vector<32x32xf32>
    %186 = vector.broadcast %165 : vector<1x32xf32> to vector<32x32xf32>
    %187 = arith.addf %185, %186 : vector<32x32xf32>
    %188 = vector.shape_cast %187 : vector<32x32xf32> to vector<4x8x32xf32>
    %c0_76 = arith.constant 0 : index
    %c0_77 = arith.constant 0 : index
    %c0_78 = arith.constant 0 : index
    %189 = vector.load %arg19[%c0_76, %c0_77, %c0_78] : memref<4x8x32xf32, #tpu.memory_space<vmem>>, vector<4x8x32xf32>
    tpu.vector_store %arg19[%c0_76, %c0_77, %c0_78], %188 {strides = array<i32>} : memref<4x8x32xf32, #tpu.memory_space<vmem>>, vector<4x8x32xf32>,
    return
  }
  func.func @transform_0(%arg0: i32) -> (i32, i32, i32) {
    %c0_i32 = arith.constant 0 : i32
    %c0_i32_0 = arith.constant 0 : i32
    %c0_i32_1 = arith.constant 0 : i32
    return %arg0, %c0_i32, %c0_i32_0 : i32, i32, i32
  }
  func.func @transform_1(%arg0: i32) -> (i32, i32, i32) {
    %c0_i32 = arith.constant 0 : i32
    %c0_i32_0 = arith.constant 0 : i32
    %c0_i32_1 = arith.constant 0 : i32
    return %arg0, %c0_i32, %c0_i32_0 : i32, i32, i32
  }
  func.func @transform_2(%arg0: i32) -> (i32, i32) {
    %c0_i32 = arith.constant 0 : i32
    %c0_i32_0 = arith.constant 0 : i32
    %c0_i32_1 = arith.constant 0 : i32
    return %c0_i32, %c0_i32_0 : i32, i32
  }
  func.func @transform_3(%arg0: i32) -> (i32, i32) {
    %c0_i32 = arith.constant 0 : i32
    %c0_i32_0 = arith.constant 0 : i32
    %c0_i32_1 = arith.constant 0 : i32
    return %c0_i32, %c0_i32_0 : i32, i32
  }
  func.func @transform_4(%arg0: i32) -> (i32, i32) {
    %c0_i32 = arith.constant 0 : i32
    %c0_i32_0 = arith.constant 0 : i32
    %c0_i32_1 = arith.constant 0 : i32
    return %c0_i32, %c0_i32_0 : i32, i32
  }
  func.func @transform_5(%arg0: i32) -> (i32, i32) {
    %c0_i32 = arith.constant 0 : i32
    %c0_i32_0 = arith.constant 0 : i32
    %c0_i32_1 = arith.constant 0 : i32
    return %c0_i32, %c0_i32_0 : i32, i32
  }
  func.func @transform_6(%arg0: i32) -> (i32, i32) {
    %c0_i32 = arith.constant 0 : i32
    %c0_i32_0 = arith.constant 0 : i32
    %c0_i32_1 = arith.constant 0 : i32
    return %c0_i32, %c0_i32_0 : i32, i32
  }
  func.func @transform_7(%arg0: i32) -> (i32, i32) {
    %c0_i32 = arith.constant 0 : i32
    %c0_i32_0 = arith.constant 0 : i32
    %c0_i32_1 = arith.constant 0 : i32
    return %c0_i32, %c0_i32_0 : i32, i32
  }
  func.func @transform_8(%arg0: i32) -> (i32, i32) {
    %c0_i32 = arith.constant 0 : i32
    %c0_i32_0 = arith.constant 0 : i32
    %c0_i32_1 = arith.constant 0 : i32
    return %c0_i32, %c0_i32_0 : i32, i32
  }
  func.func @transform_9(%arg0: i32) -> (i32, i32) {
    %c0_i32 = arith.constant 0 : i32
    %c0_i32_0 = arith.constant 0 : i32
    %c0_i32_1 = arith.constant 0 : i32
    return %c0_i32, %c0_i32_0 : i32, i32
  }
  func.func @transform_10(%arg0: i32) -> (i32, i32) {
    %c0_i32 = arith.constant 0 : i32
    %c0_i32_0 = arith.constant 0 : i32
    %c0_i32_1 = arith.constant 0 : i32
    return %c0_i32, %c0_i32_0 : i32, i32
  }
  func.func @transform_11(%arg0: i32) -> (i32, i32) {
    %c0_i32 = arith.constant 0 : i32
    %c0_i32_0 = arith.constant 0 : i32
    %c0_i32_1 = arith.constant 0 : i32
    return %c0_i32, %c0_i32_0 : i32, i32
  }
  func.func @transform_12(%arg0: i32) -> (i32, i32) {
    %c0_i32 = arith.constant 0 : i32
    %c0_i32_0 = arith.constant 0 : i32
    %c0_i32_1 = arith.constant 0 : i32
    return %c0_i32, %c0_i32_0 : i32, i32
  }
  func.func @transform_13(%arg0: i32) -> (i32, i32) {
    %c0_i32 = arith.constant 0 : i32
    %c0_i32_0 = arith.constant 0 : i32
    %c0_i32_1 = arith.constant 0 : i32
    return %c0_i32, %c0_i32_0 : i32, i32
  }
  func.func @transform_14(%arg0: i32) -> (i32, i32) {
    %c0_i32 = arith.constant 0 : i32
    %c0_i32_0 = arith.constant 0 : i32
    %c0_i32_1 = arith.constant 0 : i32
    return %c0_i32, %c0_i32_0 : i32, i32
  }
  func.func @transform_15(%arg0: i32) -> (i32, i32) {
    %c0_i32 = arith.constant 0 : i32
    %c0_i32_0 = arith.constant 0 : i32
    %c0_i32_1 = arith.constant 0 : i32
    return %c0_i32, %c0_i32_0 : i32, i32
  }
  func.func @transform_16(%arg0: i32) -> (i32, i32) {
    %c0_i32 = arith.constant 0 : i32
    %c0_i32_0 = arith.constant 0 : i32
    %c0_i32_1 = arith.constant 0 : i32
    return %c0_i32, %c0_i32_0 : i32, i32
  }
  func.func @transform_17(%arg0: i32) -> (i32, i32) {
    %c0_i32 = arith.constant 0 : i32
    %c0_i32_0 = arith.constant 0 : i32
    %c0_i32_1 = arith.constant 0 : i32
    return %c0_i32, %c0_i32_0 : i32, i32
  }
  func.func @transform_18(%arg0: i32) -> (i32, i32, i32) {
    %c0_i32 = arith.constant 0 : i32
    %c0_i32_0 = arith.constant 0 : i32
    %c0_i32_1 = arith.constant 0 : i32
    return %arg0, %c0_i32, %c0_i32_0 : i32, i32, i32
  }
}

</mosaic_0001>

<bundles_post_ra>
// kernel: tpu_custom_call.1
= control target key start
LH: loop header
LB: loop body
LE: loop exit
PB: predicated region body
PF: predicated region fallthrough
CT: control target
= control target key end

     0   :  { %s4205_s0 = inlined_call_operand.vmem [shape: f32[4,8,32], index: 0, kind: input, shape index: {}]   ;;  %s4206_s1 = inlined_call_operand.hbm [shape: f32[4,1,8], index: 1, kind: input, shape index: {}]   ;;  %s4207_s2 = inlined_call_operand.vmem [shape: bf16[32,32], index: 2, kind: input, shape index: {}]   ;;  %s4208_s3 = inlined_call_operand.vmem [shape: f32[1,32], index: 3, kind: input, shape index: {}]   ;;  %s4209_s4 = inlined_call_operand.hbm [shape: bf16[32,32], index: 4, kind: input, shape index: {}]   ;;  %s4210_s5 = inlined_call_operand.vmem [shape: f32[1,32], index: 5, kind: input, shape index: {}]   ;;  %s4211_s6 = inlined_call_operand.hbm [shape: bf16[32,32], index: 6, kind: input, shape index: {}]   ;;  %s4212_s7 = inlined_call_operand.hbm [shape: f32[1,32], index: 7, kind: input, shape index: {}]   ;;  %s4213_s8 = inlined_call_operand.hbm [shape: bf16[32,32], index: 8, kind: input, shape index: {}]   ;;  %s4214_s9 = inlined_call_operand.hbm [shape: f32[1,32], index: 9, kind: input, shape index: {}]   ;;  %s4215_s10 = inlined_call_operand.vmem [shape: f32[1,32], index: 10, kind: input, shape index: {}]   ;;  %s4216_s11 = inlined_call_operand.vmem [shape: f32[1,32], index: 11, kind: input, shape index: {}]   ;;  %s4217_s12 = inlined_call_operand.vmem [shape: bf16[32,64], index: 12, kind: input, shape index: {}]   ;;  %s4218_s13 = inlined_call_operand.vmem [shape: f32[1,64], index: 13, kind: input, shape index: {}]   ;;  %s4219_s14 = inlined_call_operand.vmem [shape: bf16[64,32], index: 14, kind: input, shape index: {}]   ;;  %s4220_s15 = inlined_call_operand.vmem [shape: f32[1,32], index: 15, kind: input, shape index: {}]   ;;  %s4221_s16 = inlined_call_operand.vmem [shape: f32[1,32], index: 16, kind: input, shape index: {}]   ;;  %s4222_s17 = inlined_call_operand.vmem [shape: f32[1,32], index: 17, kind: input, shape index: {}]   ;;  %s4223_s18 = inlined_call_operand.hbm [shape: f32[4,8,32], index: 18, kind: output, shape index: {}]  }
   0x1   :  { %4230 = sst [smem:[#allocation19_spill]] %s4205_s0 }
   0x2   :  { %4231 = sst [smem:[#allocation20_spill]] %s4206_s1 }
   0x3   :  { %4232 = sst [smem:[#allocation21_spill]] %s4207_s2 }
   0x4   :  { %4233 = sst [smem:[#allocation22_spill]] %s4223_s18 }
   0x5   :  { %23 = vsyncpa [#allocation3], 0 }
   0x6   :  { %24 = vsyncpa [#allocation6], 0 }
   0x7   :  { %25 = vsyncpa [#allocation9], 0 }
   0x8   :  { %26 = vsyncpa [#allocation12], 0 }
   0x9   :  { %27 = vsyncpa [#allocation4], 0  ;;  %s3487_s27 = smov [#allocation5]   ;;  %s3323_s0 = scalar_lea.hbm %s4209_s4, 256 }
   0xa   :  { %s51_s28 = sshll.u32 %s3487_s27, 4  ;;  %p3324_p0 = scmp.ne.s32.totalorder %s4209_s4, %s3323_s0  ;;  %s52_s28 = int_to_ptr.vmem [resolvable:$true] %s51_s28 }
   0xb   :  { %p3327_p1 = scmp.lt.u32.totalorder %s3323_s0, %s4209_s4 }
   0xd   :  { %p3329_p2 = pnand %p3327_p1, %p3324_p0 }
   0xf   :  { %3332 = shalt.err (!%p3329_p2)
}
  0x10   :  { %s3333_s22 = scalar_lea.vmem %s52_s28, 256  ;;  %p3338_p4 = scmp.lt.s32.totalorder %s52_s28, %s52_s28 }
  0x11   :  { %p3334_p3 = scmp.ne.s32.totalorder %s52_s28, %s3333_s22  ;;  %p3339_p5 = scmp.lt.s32.totalorder %s3333_s22, %s3333_s22 }
  0x13   :  { %p3340_p6 = por %p3339_p5, %p3338_p4 }
  0x15   :  { %p3341_p7 = pnand %p3340_p6, %p3334_p3 }
  0x17   :  { %3344 = shalt.err (!%p3341_p7)
}
  0x18   :  { %s4228_s2 = smov 64   ;;  %s3489_s23 = smov 4  }
  0x19   :  { %57 = dma.hbm_to_vmem [thread:$0]  %s4209_s4, 256, %s52_s28, [#allocation6], %s4228_s2, %s4228_s2, %s3489_s23  }
  0x1a   :  { %s3490_s26 = smov [#allocation8]   ;;  %s3491_s29 = smov [#allocation2]  }
  0x1b   :  { %s78_s27 = sshll.u32 %s3490_s26, 4  ;;  %s35_s30 = sshll.u32 %s3491_s29, 4  ;;  %s79_s27 = int_to_ptr.vmem [resolvable:$true] %s78_s27  ;;  %s36_s30 = int_to_ptr.vmem [resolvable:$true] %s35_s30 }
  0x1c   :  { %s3345_s1 = scalar_lea.hbm %s4212_s7, 16 }
  0x1d   :  { %p3346_p8 = scmp.ne.s32.totalorder %s4212_s7, %s3345_s1  ;;  %p3349_p9 = scmp.lt.u32.totalorder %s3345_s1, %s4212_s7 }
  0x1f   :  { %p3351_p10 = pnand %p3349_p9, %p3346_p8 }
  0x21   :  { %3354 = shalt.err (!%p3351_p10)
}
  0x22   :  { %s3355_s4 = scalar_lea.vmem %s79_s27, 16  ;;  %s3359_s28 = scalar_lea.vmem %s79_s27, 32 }
  0x23   :  { %p3356_p11 = scmp.ne.s32.totalorder %s79_s27, %s3355_s4  ;;  %p3360_p12 = scmp.lt.s32.totalorder %s79_s27, %s79_s27 }
  0x24   :  { %p3361_p13 = scmp.lt.s32.totalorder %s3359_s28, %s3355_s4 }
  0x26   :  { %p3362_p0 = por %p3361_p13, %p3360_p12 }
  0x28   :  { %p3363_p1 = pnand %p3362_p0, %p3356_p11 }
  0x2a   :  { %3366 = shalt.err (!%p3363_p1)
}
  0x2b   :  { %81 = dma.hbm_to_vmem [thread:$0]  %s4212_s7, 16, %s79_s27, [#allocation9]  }
  0x2c   :  { %s4234_s0 = sld [smem:[#allocation20_spill]] }
  0x32   :  { %s3367_s18 = scalar_lea.hbm %s4234_s0, 64 }
  0x33   :  { %p3368_p2 = scmp.ne.s32.totalorder %s4234_s0, %s3367_s18  ;;  %p3371_p3 = scmp.lt.u32.totalorder %s3367_s18, %s4234_s0 }
  0x35   :  { %p3373_p4 = pnand %p3371_p3, %p3368_p2 }
  0x37   :  { %3376 = shalt.err (!%p3373_p4)
}
  0x38   :  { %s3377_s22 = scalar_lea.vmem %s36_s30, 64  ;;  %p3382_p6 = scmp.lt.s32.totalorder %s36_s30, %s36_s30 }
  0x39   :  { %p3378_p5 = scmp.ne.s32.totalorder %s36_s30, %s3377_s22  ;;  %p3383_p7 = scmp.lt.s32.totalorder %s3377_s22, %s3377_s22 }
  0x3b   :  { %p3384_p8 = por %p3383_p7, %p3382_p6 }
  0x3d   :  { %p3385_p9 = pnand %p3384_p8, %p3378_p5 }
  0x3f   :  { %3388 = shalt.err (!%p3385_p9)
}
  0x40   :  { %s3492_s7 = smov 16   ;;  %s3493_s27 = smov 1  }
  0x41   :  { %41 = dma.hbm_to_vmem [thread:$0]  %s4234_s0, 64, %s36_s30, [#allocation3], %s3492_s7, %s3492_s7, %s3493_s27  }
  0x42   :  { %s3494_s24 = smov [#allocation7]   ;;  %s3495_s26 = smov [#allocation10]  }
  0x43   :  { %s65_s25 = sshll.u32 %s3494_s24, 4  ;;  %s87_s29 = sshll.u32 %s3495_s26, 4  ;;  %s66_s25 = int_to_ptr.vmem [resolvable:$true] %s65_s25  ;;  %s88_s29 = int_to_ptr.vmem [resolvable:$true] %s87_s29 }
  0x44   :  { %s3389_s1 = scalar_lea.hbm %s4211_s6, 256 }
  0x45   :  { %p3390_p10 = scmp.ne.s32.totalorder %s4211_s6, %s3389_s1  ;;  %p3393_p11 = scmp.lt.u32.totalorder %s3389_s1, %s4211_s6 }
  0x47   :  { %p3395_p12 = pnand %p3393_p11, %p3390_p10 }
  0x49   :  { %3398 = shalt.err (!%p3395_p12)
}
  0x4a   :  { %s3399_s30 = scalar_lea.vmem %s66_s25, 256  ;;  %p3404_p0 = scmp.lt.s32.totalorder %s66_s25, %s66_s25 }
  0x4b   :  { %p3400_p13 = scmp.ne.s32.totalorder %s66_s25, %s3399_s30  ;;  %p3405_p1 = scmp.lt.s32.totalorder %s3399_s30, %s3399_s30 }
  0x4d   :  { %p3406_p2 = por %p3405_p1, %p3404_p0 }
  0x4f   :  { %p3407_p3 = pnand %p3406_p2, %p3400_p13 }
  0x51   :  { %3410 = shalt.err (!%p3407_p3)
}
  0x52   :  { %s4235_s0 = smov 64   ;;  %s3411_s24 = scalar_lea.hbm %s4213_s8, 256 }
  0x53   :  { %71 = dma.hbm_to_vmem [thread:$0]  %s4211_s6, 256, %s66_s25, [#allocation6], %s4235_s0, %s4235_s0, %s3489_s23  }
  0x54   :  { %p3412_p4 = scmp.ne.s32.totalorder %s4213_s8, %s3411_s24  ;;  %p3415_p5 = scmp.lt.u32.totalorder %s3411_s24, %s4213_s8 }
  0x56   :  { %p3417_p6 = pnand %p3415_p5, %p3412_p4 }
  0x58   :  { %3420 = shalt.err (!%p3417_p6)
}
  0x59   :  { %s3421_s20 = scalar_lea.vmem %s88_s29, 256  ;;  %p3426_p8 = scmp.lt.s32.totalorder %s88_s29, %s88_s29 }
  0x5a   :  { %p3422_p7 = scmp.ne.s32.totalorder %s88_s29, %s3421_s20  ;;  %p3427_p9 = scmp.lt.s32.totalorder %s3421_s20, %s3421_s20 }
  0x5c   :  { %p3428_p10 = por %p3427_p9, %p3426_p8 }
  0x5e   :  { %p3429_p11 = pnand %p3428_p10, %p3422_p7 }
  0x60   :  { %3432 = shalt.err (!%p3429_p11)
}
  0x61   :  { %93 = dma.hbm_to_vmem [thread:$0]  %s4213_s8, 256, %s88_s29, [#allocation9], %s4235_s0, %s4235_s0, %s3489_s23  }
  0x62   :  { %s3496_s21 = smov [#allocation11]   ;;  %s3433_s4 = scalar_lea.hbm %s4214_s9, 16 }
  0x63   :  { %s100_s22 = sshll.u32 %s3496_s21, 4  ;;  %p3434_p12 = scmp.ne.s32.totalorder %s4214_s9, %s3433_s4  ;;  %s101_s22 = int_to_ptr.vmem [resolvable:$true] %s100_s22 }
  0x64   :  { %p3437_p13 = scmp.lt.u32.totalorder %s3433_s4, %s4214_s9 }
  0x66   :  { %p3439_p0 = pnand %p3437_p13, %p3434_p12 }
  0x68   :  { %3442 = shalt.err (!%p3439_p0)
}
  0x69   :  { %s3443_s18 = scalar_lea.vmem %s101_s22, 16  ;;  %s3447_s8 = scalar_lea.vmem %s101_s22, 32 }
  0x6a   :  { %p3444_p1 = scmp.ne.s32.totalorder %s101_s22, %s3443_s18  ;;  %p3448_p2 = scmp.lt.s32.totalorder %s101_s22, %s101_s22 }
  0x6b   :  { %p3449_p3 = scmp.lt.s32.totalorder %s3447_s8, %s3443_s18 }
  0x6d   :  { %p3450_p4 = por %p3449_p3, %p3448_p2 }
  0x6f   :  { %p3451_p5 = pnand %p3450_p4, %p3444_p1 }
  0x71   :  { %3454 = shalt.err (!%p3451_p5)
}
  0x72   :  { %103 = dma.hbm_to_vmem [thread:$0]  %s4214_s9, 16, %s101_s22, [#allocation12]  }
  0x73   :  { %3477 = dma.done.wait [#allocation3], 64  }
  0x74   :  { %3478 = vsyncadd [#allocation3], 4294967232 }
  0x75   :  { %3479 = dma.done.wait [#allocation6], 512  }
  0x76   :  { %3480 = vsyncadd [#allocation6], 4294966784 }
  0x77   :  { %3481 = dma.done.wait [#allocation9], 272  }
  0x78   :  { %3482 = vsyncadd [#allocation9], 4294967024 }
  0x79   :  { %3483 = dma.done.wait [#allocation12], 16  }
  0x7a   :  { %3484 = vsyncadd [#allocation12], 4294967280  ;;  %v3217_v0 = vld [vmem:[#allocation5] sm:$0xff]   ;;  %v3218_v1 = vld [vmem:[#allocation5 + $0x8] sm:$0xff]   ;;  %s4236_s1 = sld [smem:[#allocation21_spill]]  ;;  %s4237_s25 = sld [smem:[#allocation19_spill]] }
  0x7b   :  { %2932 = vmatprep.subr.bf16.mxu1 %v3217_v0  ;;  %vm168_vm0 = vcmask 261120   ;;  %v3221_v10 = vld [vmem:[#allocation7] sm:$0xff]   ;;  %v3222_v11 = vld [vmem:[#allocation7 + $0x8] sm:$0xff]   ;;  %v3497_v12 = vmov 0.0   ;;  %vm3498_vm1 = vmmov 0   ;;  %vm408_vm2 = vcmask 64512  }
  0x7c   :  { %2933 = vmatpush3.bf16.msra.mxu1 %v3217_v0  ;;  %v2743_v13 = vld [vmem:[%s4210_s5] ss:$0 sm:$0xff]  ;;  %v2748_v32 = vld [vmem:[#allocation8] ss:$0 sm:$0xff]  ;;  %vm676_vm3 = vcmask 1043456   ;;  %s3500_s5 = smov 112  }
  0x7d   :  { %2934 = vmatprep.subr.bf16.mxu1 %v3218_v1  ;;  %v2738_v20 = vld [vmem:[%s4208_s3] ss:$0 sm:$0xff]  ;;  %v3780_v62 = vld [vmem:[#allocation2 + $0x1] ss:$0 sm:$0xff]  ;;  %s3499_s3 = smov 120   ;;  %s3501_s23 = smov 104  }
  0x7e   :  { %v3778_v57 = vld [vmem:[#allocation2] ss:$0 sm:$0xff]  ;;  %s3502_s29 = smov 8   ;;  %vm2254_vm4 = vcmask 130048   ;;  %vm2259_vm5 = vcmask 195584   ;;  %vm2580_vm6 = vcmask 523264  }
  0x7f   :  { %s3504_s6 = smov [#allocation13]  }
  0x80   :  { %v3219_v2 = vld [vmem:[%s4236_s1] sm:$0xff]   ;;  %v140_v4 = vld [vmem:[%s4237_s25 + $0x8] sm:$0xff]  ;;  %v141_v5 = vld [vmem:[%s4237_s25 + $0x10] sm:$0xff]  ;;  %2935 = vmatpush3.bf16.msra.mxu1 %v3218_v1 }
  0x81   :  { %v139_v3 = vld [vmem:[%s4237_s25] sm:$0xff]  ;;  %2924 = vmatprep.subr.bf16.mxu0 %v3219_v2  ;;  %v142_v7 = vld [vmem:[%s4237_s25 + $0x18] sm:$0xff]  ;;  %v3220_v8 = vld [vmem:[%s4236_s1 + $0x8] sm:$0xff]   ;;  %2948 = vmatprep.subr.bf16.mxu1 %v3497_v12 }
  0x82   :  { %v143_v6 = vpack.c.bf16 %v140_v4, %v139_v3  ;;  %2925 = vmatpush3.bf16.msra.mxu0 %v3219_v2  ;;  %v144_v9 = vpack.c.bf16 %v142_v7, %v141_v5 }
  0x83   :  { %2926 = vmatprep.subr.bf16.mxu0 %v3220_v8 }
  0x84   :  { %2936 = vmatprep.mubr.msk.bf16.mxu1 %vm168_vm0, %v143_v6  ;;  %2928 = vmatprep.mubr.msk.bf16.mxu0 %vm168_vm0, %v143_v6 }
  0x85   :  { %2937 = vmatmul.mubr.msk.bf16.vlgmr.msra.gmra.mrb[0].mxu1 %vm168_vm0, %v144_v9 }
  0x86   :  { %2927 = vmatpush3.bf16.msra.mxu0 %v3220_v8  ;;  %2950 = vmatprep.mubr.msk.bf16.mxu1 %vm3498_vm1, %v3497_v12  ;;  %v3785_v8 = vld [vmem:[#allocation2 + $0x2] ss:$0 sm:$0xff] }
  0x87   :  { %2940 = vmatprep.subr.bf16.mxu0 %v3221_v10 }
  0x89   :  { %2929 = vmatmul.mubr.msk.bf16.vlgmr.msra.gmra.mrb[0].mxu0 %vm168_vm0, %v144_v9 }
  0x8a   :  { %2941 = vmatpush3.bf16.msra.mxu0 %v3221_v10  ;;  %2944 = vmatprep.mubr.msk.bf16.mxu0 %vm168_vm0, %v143_v6 }
  0x8b   :  { %2942 = vmatprep.subr.bf16.mxu0 %v3222_v11 }
  0x8e   :  { %2943 = vmatpush3.bf16.msra.mxu0 %v3222_v11 }
  0x8f   :  { %2954 = vmatprep.subr.bf16.mxu0 %v3497_v12 }
  0x91   :  { %2945 = vmatmul.mubr.msk.bf16.vlgmr.msra.gmra.mrb[4].mxu0 %vm168_vm0, %v144_v9 }
  0x92   :  { %2956 = vmatprep.mubr.msk.bf16.mxu0 %vm3498_vm1, %v3497_v12 }
 0x158   :  { %v2938_v14 = vpop.f32.mrb[0].mxu1 }
 0x159   :  { %v281_v15 = vpop.f32.mrb[1].mxu1  ;;  %v290_v26 = vadd.f32 %v2938_v14, %v2743_v13 }
 0x15a   :  { %v282_v16 = vadd.f32 %v2743_v13, %v281_v15  ;;  %v2939_v17 = vpop.f32.mrb[2].mxu1  ;;  %v3788_v15 = vld [vmem:[#allocation2 + $0x3] ss:$0 sm:$0xff] }
 0x15b   :  { %v284_v19 = vpop.f32.mrb[3].mxu1  ;;  %v293_v30 = vadd.f32 %v2939_v17, %v2743_v13  ;;  %v3729_v33 = vpack.c.bf16 %v290_v26, %v290_v26 }
 0x15c   :  { %v2930_v18 = vpop.f32.mrb[0].mxu0  ;;  %v3720_v22 = vpack.c.bf16 %v282_v16, %v282_v16  ;;  %v285_v23 = vadd.f32 %v2743_v13, %v284_v19 }
 0x15d   :  { %v209_v21 = vpop.f32.mrb[1].mxu0  ;;  %v3736_v39 = vpack.c.bf16 %v293_v30, %v293_v30  ;;  %v505_v44 = vsel %vm408_vm2, %v3729_v33, 0  ;;  %v218_v45 = vadd.f32 %v2930_v18, %v2738_v20 }
 0x15e   :  { %v2931_v24 = vpop.f32.mrb[2].mxu0  ;;  %v3722_v27 = vpack.c.bf16 %v285_v23, %v285_v23  ;;  %v210_v28 = vadd.f32 %v2738_v20, %v209_v21  ;;  %v413_v29 = vsel %vm408_vm2, %v3720_v22, 0 }
 0x15f   :  { %v212_v25 = vpop.f32.mrb[3].mxu0  ;;  %2949 = vmatpush3.bf16.xpose.msra.mxu1 %v413_v29  ;;  %v551_v46 = vsel %vm408_vm2, %v3736_v39, 0  ;;  %v221_v47 = vadd.f32 %v2931_v24, %v2738_v20  ;;  %v3756_v48 = vpack.c.bf16 %v218_v45, %v218_v45 }
 0x160   :  { %v459_v31 = vsel %vm408_vm2, %v3722_v27, 0  ;;  %2960 = vmatprep.subr.bf16.mxu1 %v3497_v12  ;;  %v3731_v34 = vpack.c.bf16 %v210_v28, %v210_v28  ;;  %v213_v35 = vadd.f32 %v2738_v20, %v212_v25 }
 0x161   :  { %2955 = vmatpush3.bf16.xpose.msra.mxu0 %v459_v31  ;;  %v3758_v49 = vpack.c.bf16 %v221_v47, %v221_v47 }
 0x162   :  { %2966 = vmatprep.subr.bf16.mxu0 %v3497_v12  ;;  %v3740_v43 = vpack.c.bf16 %v213_v35, %v213_v35 }
 0x164   :  { %v2946_v36 = vpop.f32.mrb[4].mxu0 }
 0x165   :  { %v3734_v37 = vadd.f32 %v2946_v36, %v2748_v32  ;;  %v353_v38 = vpop.f32.mrb[5].mxu0 }
 0x166   :  { %v2947_v40 = vpop.f32.mrb[6].mxu0  ;;  %2951 = vmatmul.mubr.msk.bf16.vlgmr.msra.gmra.mrb[4].mxu1 %vm408_vm2, %v3731_v34  ;;  %v354_v50 = vadd.f32 %v2748_v32, %v353_v38 }
 0x167   :  { %v3738_v41 = vadd.f32 %v2947_v40, %v2748_v32  ;;  %v356_v42 = vpop.f32.mrb[7].mxu0  ;;  %2961 = vmatpush3.bf16.xpose.msra.mxu1 %v505_v44  ;;  %2962 = vmatprep.mubr.msk.bf16.mxu1 %vm3498_vm1, %v3497_v12 }
 0x168   :  { %2957 = vmatmul.mubr.msk.bf16.vlgmr.msra.gmra.mrb[8].mxu0 %vm408_vm2, %v3740_v43  ;;  %2972 = vmatprep.subr.bf16.mxu1 %v3497_v12  ;;  %v357_v51 = vadd.f32 %v2748_v32, %v356_v42  ;;  %v3768_v52 = vpack.c.bf16 %v354_v50, %v354_v50 }
 0x169   :  { %2967 = vmatpush3.bf16.xpose.msra.mxu0 %v551_v46  ;;  %2968 = vmatprep.mubr.msk.bf16.mxu0 %vm3498_vm1, %v3497_v12 }
 0x16a   :  { %2978 = vmatprep.subr.bf16.mxu0 %v3497_v12  ;;  %v3770_v53 = vpack.c.bf16 %v357_v51, %v357_v51  ;;  %v678_v54 = vsel %vm676_vm3, %v3768_v52, 0 }
 0x16c   :  { %v724_v55 = vsel %vm676_vm3, %v3770_v53, 0 }
 0x16e   :  { %2963 = vmatmul.mubr.msk.bf16.vlgmr.msra.gmra.mrb[8].mxu1 %vm408_vm2, %v3756_v48 }
 0x16f   :  { %2974 = vmatprep.mubr.msk.bf16.mxu1 %vm3498_vm1, %v3497_v12  ;;  %2973 = vmatpush3.bf16.msra.mxu1 %v678_v54 }
 0x170   :  { %2969 = vmatmul.mubr.msk.bf16.vlgmr.msra.gmra.mrb[12].mxu0 %vm408_vm2, %v3758_v49  ;;  %2984 = vmatprep.subr.bf16.mxu1 %v3497_v12 }
 0x171   :  { %2980 = vmatprep.mubr.msk.bf16.mxu0 %vm3498_vm1, %v3497_v12  ;;  %2979 = vmatpush3.bf16.msra.mxu0 %v724_v55 }
 0x172   :  { %2990 = vmatprep.subr.bf16.mxu0 %v3497_v12 }
 0x239   :  { %v449_v56 = vpop.f32.mrb[4].mxu1 }
 0x23a   :  { %v593_v58 = vmul.f32 0.35355338, %v449_v56  ;;  %v2952_v59 = vpop.f32.mrb[5].mxu1 }
 0x23b   :  { %v452_v60 = vpop.f32.mrb[6].mxu1  ;;  %v495_v61 = vpop.f32.mrb[8].mxu0 }
 0x23c   :  { %v594_v63 = vmul.f32 0.35355338, %v495_v61  ;;  %v2953_v0 = vpop.f32.mrb[7].mxu1  ;;  %v2958_v1 = vpop.f32.mrb[9].mxu0  ;;  %v621_v2 = vadd.f32 %v3778_v57, %v593_v58 }
 0x23d   :  { %v498_v3 = vpop.f32.mrb[10].mxu0 }
 0x23e   :  { %v2959_v4 = vpop.f32.mrb[11].mxu0  ;;  %v625_v5 = vsel %vm408_vm2, %v621_v2, -inf  ;;  %v622_v6 = vadd.f32 %v3780_v62, %v594_v63  ;;  %v3816_v63 = vpack.c.bf16 %v3734_v37, %v3734_v37  ;;  %v3820_v3 = vpack.c.bf16 %v3738_v41, %v3738_v41 }
 0x23f   :  { %626 = vmax.xlane.f32.xlu0 %v625_v5 }
 0x240   :  { %v628_v11 = vsel %vm408_vm2, %v622_v6, -inf  ;;  %v770_v5 = vsel %vm676_vm3, %v3816_v63, 0  ;;  %v816_v41 = vsel %vm676_vm3, %v3820_v3, 0 }
 0x241   :  { %v541_v7 = vpop.f32.mrb[8].mxu1 }
 0x242   :  { %v595_v9 = vmul.f32 0.35355338, %v541_v7  ;;  %v2964_v10 = vpop.f32.mrb[9].mxu1 }
 0x243   :  { %v587_v13 = vpop.f32.mrb[12].mxu0  ;;  %629 = vmax.xlane.f32.xlu0 %v628_v11  ;;  %v544_v14 = vpop.f32.mrb[10].mxu1 }
 0x244   :  { %v596_v16 = vmul.f32 0.35355338, %v587_v13  ;;  %v2965_v17 = vpop.f32.mrb[11].mxu1  ;;  %v2970_v18 = vpop.f32.mrb[13].mxu0  ;;  %v623_v19 = vadd.f32 %v3785_v8, %v595_v9 }
 0x245   :  { %v590_v20 = vpop.f32.mrb[14].mxu0 }
 0x246   :  { %v2971_v21 = vpop.f32.mrb[15].mxu0  ;;  %v631_v23 = vsel %vm408_vm2, %v623_v19, -inf  ;;  %v624_v24 = vadd.f32 %v3788_v15, %v596_v16 }
 0x247   :  { %632 = vmax.xlane.f32.xlu1 %v631_v23 }
 0x248   :  { %v634_v25 = vsel %vm408_vm2, %v624_v24, -inf }
 0x24b   :  { %635 = vmax.xlane.f32.xlu1 %v634_v25 }
 0x2cc   :  { %v627_v26 = vpop.xlane.xlu0 %626 }
 0x2cd   :  { %v637_v28 = vsub.f32 %v621_v2, %v627_v26 }
 0x2cf   :  { %v641_v29 = vmul.f32 1.442695, %v637_v28 }
 0x2d0   :  { %v630_v30 = vpop.xlane.xlu0 %629 }
 0x2d1   :  { %3231 = vpow2.f32 %v641_v29  ;;  %v638_v31 = vsub.f32 %v622_v6, %v630_v30 }
 0x2d3   :  { %v643_v32 = vmul.f32 1.442695, %v638_v31 }
 0x2d4   :  { %v633_v35 = vpop.xlane.xlu1 %632 }
 0x2d5   :  { %3233 = vpow2.f32 %v643_v32  ;;  %v639_v36 = vsub.f32 %v623_v19, %v633_v35 }
 0x2d7   :  { %v645_v38 = vmul.f32 1.442695, %v639_v36 }
 0x2d8   :  { %v636_v50 = vpop.xlane.xlu1 %635 }
 0x2d9   :  { %3235 = vpow2.f32 %v645_v38  ;;  %v640_v51 = vsub.f32 %v624_v24, %v636_v50 }
 0x2db   :  { %v3232_v40 = vpop.eup %3231  ;;  %v647_v54 = vmul.f32 1.442695, %v640_v51 }
 0x2dc   :  { %v649_v42 = vsel %vm408_vm2, %v3232_v40, 0.0 }
 0x2dd   :  { %650 = vadd.xlane.f32.xlu0 %v649_v42  ;;  %3237 = vpow2.f32 %v647_v54 }
 0x2df   :  { %v3234_v44 = vpop.eup %3233 }
 0x2e0   :  { %v652_v45 = vsel %vm408_vm2, %v3234_v44, 0.0 }
 0x2e1   :  { %653 = vadd.xlane.f32.xlu1 %v652_v45 }
 0x2e3   :  { %v3236_v46 = vpop.eup %3235 }
 0x2e4   :  { %v655_v47 = vsel %vm408_vm2, %v3236_v46, 0.0 }
 0x2e5   :  { %656 = vadd.xlane.f32.xlu0 %v655_v47 }
 0x2e7   :  { %v3238_v55 = vpop.eup %3237 }
 0x2e8   :  { %v658_v56 = vsel %vm408_vm2, %v3238_v55, 0.0 }
 0x2f2   :  { %910 = vrot.lane.b32.xlu1 %v3722_v27, %s3499_s3 }
 0x2f6   :  { %858 = vrot.lane.b32.xlu1 %v3731_v34, %s3499_s3 }
 0x2fb   :  { %860 = vrot.lane.b32.xlu0 %v3720_v22, %s3499_s3 }
 0x2ff   :  { %960 = vrot.lane.b32.xlu0 %v3729_v33, %s3499_s3 }
 0x303   :  { %958 = vrot.lane.b32.xlu0 %v3756_v48, %s3499_s3 }
 0x31a   :  { %659 = vadd.xlane.f32.xlu1 %v658_v56 }
 0x32b   :  { %908 = vrot.lane.b32.xlu1 %v3740_v43, %s3499_s3 }
 0x32f   :  { %1010 = vrot.lane.b32.xlu1 %v3736_v39, %s3499_s3 }
 0x333   :  { %1008 = vrot.lane.b32.xlu1 %v3758_v49, %s3499_s3 }
 0x36a   :  { %v651_v58 = vpop.xlane.xlu0 %650 }
 0x36b   :  { %3239 = vrcp.f32 %v651_v58 }
 0x36e   :  { %v654_v59 = vpop.xlane.xlu1 %653 }
 0x36f   :  { %3241 = vrcp.f32 %v654_v59 }
 0x372   :  { %v657_v60 = vpop.xlane.xlu0 %656  ;;  %v911_v13 = vpop.permute.xlu1 %910 }
 0x373   :  { %3243 = vrcp.f32 %v657_v60  ;;  %v916_v25 = vsel %vm408_vm2, %v911_v13, 0 }
 0x375   :  { %v3240_v61 = vpop.eup %3239 }
 0x376   :  { %v665_v0 = vmul.f32 %v3240_v61, %v3232_v40  ;;  %v861_v9 = vpop.permute.xlu0 %860  ;;  %v859_v16 = vpop.permute.xlu1 %858 }
 0x377   :  { %v866_v11 = vsel %vm408_vm2, %v861_v9, 0 }
 0x378   :  { %v669_v1 = vpack.c.bf16 %v665_v0, %v665_v0 }
 0x379   :  { %v3242_v2 = vpop.eup %3241 }
 0x37a   :  { %v666_v4 = vmul.f32 %v3242_v2, %v3234_v44  ;;  %2975 = vmatmul.mubr.msk.bf16.vlgmr.msra.gmra.mrb[12].mxu1 %vm408_vm2, %v669_v1  ;;  %v961_v14 = vpop.permute.xlu0 %960 }
 0x37b   :  { %2985 = vmatpush3.bf16.msra.mxu1 %v770_v5  ;;  %2986 = vmatprep.mubr.msk.bf16.mxu1 %vm3498_vm1, %v3497_v12  ;;  %v966_v17 = vsel %vm408_vm2, %v961_v14, 0 }
 0x37c   :  { %v670_v6 = vpack.c.bf16 %v666_v4, %v666_v4  ;;  %2996 = vmatprep.subr.bf16.mxu1 %v3497_v12 }
 0x37d   :  { %v3244_v37 = vpop.eup %3243 }
 0x37e   :  { %v667_v7 = vmul.f32 %v3244_v37, %v3236_v46  ;;  %2981 = vmatmul.mubr.msk.bf16.vlgmr.msra.gmra.mrb[16].mxu0 %vm408_vm2, %v670_v6  ;;  %v959_v18 = vpop.permute.xlu0 %958 }
 0x37f   :  { %2991 = vmatpush3.bf16.msra.mxu0 %v816_v41  ;;  %2992 = vmatprep.mubr.msk.bf16.mxu0 %vm3498_vm1, %v3497_v12 }
 0x380   :  { %v671_v10 = vpack.c.bf16 %v667_v7, %v667_v7  ;;  %3002 = vmatprep.subr.bf16.mxu0 %v3497_v12 }
 0x382   :  { %2987 = vmatmul.mubr.msk.bf16.vlgmr.msra.gmra.mrb[16].mxu1 %vm408_vm2, %v671_v10 }
 0x383   :  { %2998 = vmatprep.mubr.msk.bf16.mxu1 %vm3498_vm1, %v3497_v12 }
 0x384   :  { %2997 = vmatpush3.bf16.xpose.msra.mxu1 %v866_v11 }
 0x385   :  { %3008 = vmatprep.subr.bf16.mxu1 %v3497_v12 }
 0x38b   :  { %2999 = vmatmul.mubr.msk.bf16.vlgmr.msra.gmra.mrb[20].mxu1 %vm408_vm2, %v859_v16 }
 0x38c   :  { %3009 = vmatpush3.bf16.xpose.msra.mxu1 %v966_v17  ;;  %3010 = vmatprep.mubr.msk.bf16.mxu1 %vm3498_vm1, %v3497_v12 }
 0x38d   :  { %3020 = vmatprep.subr.bf16.mxu1 %v3497_v12 }
 0x393   :  { %3011 = vmatmul.mubr.msk.bf16.vlgmr.msra.gmra.mrb[24].mxu1 %vm408_vm2, %v959_v18 }
 0x394   :  { %3022 = vmatprep.mubr.msk.bf16.mxu1 %vm3498_vm1, %v3497_v12 }
 0x3a7   :  { %v660_v19 = vpop.xlane.xlu1 %659 }
 0x3a8   :  { %3245 = vrcp.f32 %v660_v19 }
 0x3ab   :  { %v909_v24 = vpop.permute.xlu1 %908 }
 0x3af   :  { %v1011_v26 = vpop.permute.xlu1 %1010 }
 0x3b0   :  { %v1016_v28 = vsel %vm408_vm2, %v1011_v26, 0 }
 0x3b2   :  { %v3246_v20 = vpop.eup %3245 }
 0x3b3   :  { %v668_v21 = vmul.f32 %v3246_v20, %v3238_v55  ;;  %v1009_v29 = vpop.permute.xlu1 %1008 }
 0x3b5   :  { %v672_v23 = vpack.c.bf16 %v668_v21, %v668_v21 }
 0x3b7   :  { %2993 = vmatmul.mubr.msk.bf16.vlgmr.msra.gmra.mrb[20].mxu0 %vm408_vm2, %v672_v23 }
 0x3b8   :  { %3003 = vmatpush3.bf16.xpose.msra.mxu0 %v916_v25  ;;  %3004 = vmatprep.mubr.msk.bf16.mxu0 %vm3498_vm1, %v3497_v12 }
 0x3b9   :  { %3014 = vmatprep.subr.bf16.mxu0 %v3497_v12 }
 0x3bf   :  { %3005 = vmatmul.mubr.msk.bf16.vlgmr.msra.gmra.mrb[24].mxu0 %vm408_vm2, %v909_v24 }
 0x3c0   :  { %3015 = vmatpush3.bf16.xpose.msra.mxu0 %v1016_v28  ;;  %3016 = vmatprep.mubr.msk.bf16.mxu0 %vm3498_vm1, %v3497_v12 }
 0x3c1   :  { %3026 = vmatprep.subr.bf16.mxu0 %v3497_v12 }
 0x3c7   :  { %3017 = vmatmul.mubr.msk.bf16.vlgmr.msra.gmra.mrb[28].mxu0 %vm408_vm2, %v1009_v29 }
 0x3c8   :  { %3028 = vmatprep.mubr.msk.bf16.mxu0 %vm3498_vm1, %v3497_v12 }
 0x44d   :  { %v3860_v30 = vpop.f32.mrb[12].mxu1 }
 0x44e   :  { %v2976_v31 = vpop.f32.mrb[13].mxu1 }
 0x44f   :  { %v717_v32 = vpop.f32.mrb[14].mxu1 }
 0x450   :  { %v2977_v35 = vpop.f32.mrb[15].mxu1 }
 0x451   :  { %v3862_v36 = vpop.f32.mrb[16].mxu0 }
 0x452   :  { %v2982_v38 = vpop.f32.mrb[17].mxu0 }
 0x453   :  { %v763_v40 = vpop.f32.mrb[18].mxu0 }
 0x454   :  { %v2983_v42 = vpop.f32.mrb[19].mxu0 }
 0x455   :  { %v3864_v44 = vpop.f32.mrb[16].mxu1 }
 0x456   :  { %v2988_v45 = vpop.f32.mrb[17].mxu1 }
 0x457   :  { %v809_v46 = vpop.f32.mrb[18].mxu1 }
 0x458   :  { %v2989_v47 = vpop.f32.mrb[19].mxu1 }
 0x45e   :  { %v902_v50 = vpop.f32.mrb[20].mxu1 }
 0x45f   :  { %v1058_v51 = vmul.f32 0.35355338, %v902_v50  ;;  %v3000_v54 = vpop.f32.mrb[21].mxu1 }
 0x460   :  { %v905_v55 = vpop.f32.mrb[22].mxu1 }
 0x461   :  { %v3001_v56 = vpop.f32.mrb[23].mxu1  ;;  %v1062_v58 = vadd.f32 %v3778_v57, %v1058_v51 }
 0x463   :  { %v1066_v59 = vsel %vm408_vm2, %v1062_v58, -inf }
 0x464   :  { %1067 = vmax.xlane.f32.xlu0 %v1066_v59 }
 0x466   :  { %v1002_v60 = vpop.f32.mrb[24].mxu1 }
 0x467   :  { %v1060_v61 = vmul.f32 0.35355338, %v1002_v60  ;;  %v3012_v0 = vpop.f32.mrb[25].mxu1 }
 0x468   :  { %v1005_v1 = vpop.f32.mrb[26].mxu1 }
 0x469   :  { %v3013_v2 = vpop.f32.mrb[27].mxu1  ;;  %v1064_v4 = vadd.f32 %v3785_v8, %v1060_v61 }
 0x46b   :  { %v1072_v5 = vsel %vm408_vm2, %v1064_v4, -inf }
 0x46c   :  { %1073 = vmax.xlane.f32.xlu0 %v1072_v5 }
 0x48a   :  { %v3870_v6 = vpop.f32.mrb[20].mxu0 }
 0x48b   :  { %v2994_v37 = vpop.f32.mrb[21].mxu0 }
 0x48c   :  { %v855_v7 = vpop.f32.mrb[22].mxu0 }
 0x48d   :  { %v2995_v41 = vpop.f32.mrb[23].mxu0 }
 0x492   :  { %v952_v9 = vpop.f32.mrb[24].mxu0 }
 0x493   :  { %v1059_v10 = vmul.f32 0.35355338, %v952_v9  ;;  %v3006_v11 = vpop.f32.mrb[25].mxu0 }
 0x494   :  { %v955_v13 = vpop.f32.mrb[26].mxu0 }
 0x495   :  { %v3007_v14 = vpop.f32.mrb[27].mxu0  ;;  %v1063_v16 = vadd.f32 %v3780_v62, %v1059_v10 }
 0x497   :  { %v1069_v17 = vsel %vm408_vm2, %v1063_v16, -inf }
 0x498   :  { %1070 = vmax.xlane.f32.xlu1 %v1069_v17 }
 0x49a   :  { %v1052_v18 = vpop.f32.mrb[28].mxu0 }
 0x49b   :  { %v1061_v19 = vmul.f32 0.35355338, %v1052_v18  ;;  %v3018_v20 = vpop.f32.mrb[29].mxu0 }
 0x49c   :  { %v1055_v21 = vpop.f32.mrb[30].mxu0 }
 0x49d   :  { %v3019_v23 = vpop.f32.mrb[31].mxu0  ;;  %v1065_v24 = vadd.f32 %v3788_v15, %v1061_v19 }
 0x49f   :  { %v1075_v25 = vsel %vm408_vm2, %v1065_v24, -inf }
 0x4a0   :  { %1076 = vmax.xlane.f32.xlu0 %v1075_v25 }
 0x4a9   :  { %1162 = vrot.lane.b32.xlu1 %v3770_v53, %s3499_s3 }
 0x4ad   :  { %1210 = vrot.lane.b32.xlu1 %v3816_v63, %s3499_s3 }
 0x4b1   :  { %1258 = vrot.lane.b32.xlu1 %v3820_v3, %s3499_s3 }
 0x4f1   :  { %v1068_v26 = vpop.xlane.xlu0 %1067 }
 0x4f2   :  { %v1078_v28 = vsub.f32 %v1062_v58, %v1068_v26 }
 0x4f4   :  { %v1082_v29 = vmul.f32 1.442695, %v1078_v28 }
 0x4f6   :  { %3247 = vpow2.f32 %v1082_v29 }
 0x4f9   :  { %v1074_v35 = vpop.xlane.xlu0 %1073 }
 0x4fa   :  { %v1080_v38 = vsub.f32 %v1064_v4, %v1074_v35 }
 0x4fc   :  { %v1086_v40 = vmul.f32 1.442695, %v1080_v38 }
 0x4fe   :  { %3249 = vpow2.f32 %v1086_v40 }
 0x500   :  { %v3248_v31 = vpop.eup %3247 }
 0x501   :  { %v1090_v32 = vsel %vm408_vm2, %v3248_v31, 0.0 }
 0x502   :  { %1091 = vadd.xlane.f32.xlu0 %v1090_v32 }
 0x508   :  { %v3250_v51 = vpop.eup %3249 }
 0x509   :  { %v1096_v56 = vsel %vm408_vm2, %v3250_v51, 0.0 }
 0x518   :  { %1114 = vrot.lane.b32.xlu0 %v3768_v52, %s3499_s3 }
 0x525   :  { %v1071_v42 = vpop.xlane.xlu1 %1070 }
 0x526   :  { %v1079_v45 = vsub.f32 %v1063_v16, %v1071_v42 }
 0x528   :  { %v1084_v46 = vmul.f32 1.442695, %v1079_v45 }
 0x529   :  { %v1163_v47 = vpop.permute.xlu1 %1162 }
 0x52a   :  { %3251 = vpow2.f32 %v1084_v46  ;;  %v1168_v50 = vsel %vm676_vm3, %v1163_v47, 0 }
 0x52b   :  { %3027 = vmatpush3.bf16.msra.mxu0 %v1168_v50 }
 0x52c   :  { %3038 = vmatprep.subr.bf16.mxu0 %v3497_v12 }
 0x52d   :  { %v1077_v58 = vpop.xlane.xlu0 %1076  ;;  %v1211_v7 = vpop.permute.xlu1 %1210 }
 0x52e   :  { %v1081_v59 = vsub.f32 %v1065_v24, %v1077_v58  ;;  %v1216_v9 = vsel %vm676_vm3, %v1211_v7, 0 }
 0x530   :  { %v1088_v60 = vmul.f32 1.442695, %v1081_v59 }
 0x531   :  { %v1259_v10 = vpop.permute.xlu1 %1258 }
 0x532   :  { %3253 = vpow2.f32 %v1088_v60  ;;  %v1264_v23 = vsel %vm676_vm3, %v1259_v10, 0 }
 0x534   :  { %v3252_v54 = vpop.eup %3251 }
 0x535   :  { %v1093_v55 = vsel %vm408_vm2, %v3252_v54, 0.0 }
 0x536   :  { %1094 = vadd.xlane.f32.xlu1 %v1093_v55 }
 0x537   :  { %1097 = vadd.xlane.f32.xlu0 %v1096_v56 }
 0x53c   :  { %v3254_v61 = vpop.eup %3253 }
 0x53d   :  { %v1099_v0 = vsel %vm408_vm2, %v3254_v61, 0.0 }
 0x547   :  { %1358 = vrot.lane.b32.xlu1 %v3722_v27, %s3500_s5 }
 0x54d   :  { %1308 = vrot.lane.b32.xlu0 %v3720_v22, %s3500_s5 }
 0x551   :  { %1306 = vrot.lane.b32.xlu0 %v3731_v34, %s3500_s5 }
 0x555   :  { %1408 = vrot.lane.b32.xlu0 %v3729_v33, %s3500_s5 }
 0x559   :  { %1406 = vrot.lane.b32.xlu0 %v3756_v48, %s3500_s5 }
 0x56b   :  { %1100 = vadd.xlane.f32.xlu1 %v1099_v0 }
 0x57c   :  { %1356 = vrot.lane.b32.xlu1 %v3740_v43, %s3500_s5 }
 0x580   :  { %1458 = vrot.lane.b32.xlu1 %v3736_v39, %s3500_s5 }
 0x584   :  { %1456 = vrot.lane.b32.xlu1 %v3758_v49, %s3500_s5 }
 0x58f   :  { %v1092_v1 = vpop.xlane.xlu0 %1091 }
 0x590   :  { %3255 = vrcp.f32 %v1092_v1 }
 0x593   :  { %v1115_v2 = vpop.permute.xlu0 %1114 }
 0x594   :  { %v1120_v4 = vsel %vm676_vm3, %v1115_v2, 0 }
 0x595   :  { %3021 = vmatpush3.bf16.msra.mxu1 %v1120_v4 }
 0x596   :  { %3032 = vmatprep.subr.bf16.mxu1 %v3497_v12 }
 0x59a   :  { %v3256_v5 = vpop.eup %3255 }
 0x59b   :  { %v1106_v37 = vmul.f32 %v3256_v5, %v3248_v31 }
 0x59d   :  { %v1110_v41 = vpack.c.bf16 %v1106_v37, %v1106_v37 }
 0x59f   :  { %3023 = vmatmul.mubr.msk.bf16.vlgmr.msra.gmra.mrb[28].mxu1 %vm408_vm2, %v1110_v41 }
 0x5a0   :  { %3033 = vmatpush3.bf16.msra.mxu1 %v1216_v9  ;;  %3034 = vmatprep.mubr.msk.bf16.mxu1 %vm3498_vm1, %v3497_v12 }
 0x5a1   :  { %3044 = vmatprep.subr.bf16.mxu1 %v3497_v12 }
 0x5c3   :  { %v1095_v11 = vpop.xlane.xlu1 %1094 }
 0x5c4   :  { %3257 = vrcp.f32 %v1095_v11  ;;  %v1098_v13 = vpop.xlane.xlu0 %1097 }
 0x5c5   :  { %3259 = vrcp.f32 %v1098_v13 }
 0x5c7   :  { %v1359_v31 = vpop.permute.xlu1 %1358 }
 0x5c8   :  { %v1309_v14 = vpop.permute.xlu0 %1308  ;;  %v1364_v45 = vsel %vm408_vm2, %v1359_v31, 0 }
 0x5c9   :  { %v1314_v25 = vsel %vm408_vm2, %v1309_v14, 0 }
 0x5cc   :  { %v1307_v24 = vpop.permute.xlu0 %1306 }
 0x5ce   :  { %v3258_v16 = vpop.eup %3257 }
 0x5cf   :  { %v3260_v17 = vpop.eup %3259  ;;  %v1107_v18 = vmul.f32 %v3258_v16, %v3252_v54 }
 0x5d0   :  { %v1108_v19 = vmul.f32 %v3260_v17, %v3250_v51  ;;  %v1409_v26 = vpop.permute.xlu0 %1408 }
 0x5d1   :  { %v1111_v20 = vpack.c.bf16 %v1107_v18, %v1107_v18  ;;  %v1414_v28 = vsel %vm408_vm2, %v1409_v26, 0 }
 0x5d2   :  { %v1112_v21 = vpack.c.bf16 %v1108_v19, %v1108_v19 }
 0x5d3   :  { %3029 = vmatmul.mubr.msk.bf16.vlgmr.msra.gmra.mrb[32].mxu0 %vm408_vm2, %v1111_v20 }
 0x5d4   :  { %3035 = vmatmul.mubr.msk.bf16.vlgmr.msra.gmra.mrb[32].mxu1 %vm408_vm2, %v1112_v21  ;;  %3039 = vmatpush3.bf16.msra.mxu0 %v1264_v23  ;;  %v1407_v29 = vpop.permute.xlu0 %1406 }
 0x5d5   :  { %3045 = vmatpush3.bf16.xpose.msra.mxu1 %v1314_v25  ;;  %3046 = vmatprep.mubr.msk.bf16.mxu1 %vm3498_vm1, %v3497_v12 }
 0x5d6   :  { %3056 = vmatprep.subr.bf16.mxu1 %v3497_v12  ;;  %3040 = vmatprep.mubr.msk.bf16.mxu0 %vm3498_vm1, %v3497_v12 }
 0x5d7   :  { %3050 = vmatprep.subr.bf16.mxu0 %v3497_v12 }
 0x5dc   :  { %3047 = vmatmul.mubr.msk.bf16.vlgmr.msra.gmra.mrb[36].mxu1 %vm408_vm2, %v1307_v24 }
 0x5dd   :  { %3057 = vmatpush3.bf16.xpose.msra.mxu1 %v1414_v28  ;;  %3058 = vmatprep.mubr.msk.bf16.mxu1 %vm3498_vm1, %v3497_v12 }
 0x5de   :  { %3068 = vmatprep.subr.bf16.mxu1 %v3497_v12 }
 0x5e4   :  { %3059 = vmatmul.mubr.msk.bf16.vlgmr.msra.gmra.mrb[40].mxu1 %vm408_vm2, %v1407_v29 }
 0x5e5   :  { %3070 = vmatprep.mubr.msk.bf16.mxu1 %vm3498_vm1, %v3497_v12 }
 0x5f8   :  { %v1101_v32 = vpop.xlane.xlu1 %1100 }
 0x5f9   :  { %3261 = vrcp.f32 %v1101_v32 }
 0x5fc   :  { %v1357_v42 = vpop.permute.xlu1 %1356 }
 0x600   :  { %v1459_v46 = vpop.permute.xlu1 %1458 }
 0x601   :  { %v1464_v47 = vsel %vm408_vm2, %v1459_v46, 0 }
 0x603   :  { %v3262_v35 = vpop.eup %3261 }
 0x604   :  { %v1109_v38 = vmul.f32 %v3262_v35, %v3254_v61  ;;  %v1457_v50 = vpop.permute.xlu1 %1456 }
 0x606   :  { %v1113_v40 = vpack.c.bf16 %v1109_v38, %v1109_v38 }
 0x608   :  { %3041 = vmatmul.mubr.msk.bf16.vlgmr.msra.gmra.mrb[36].mxu0 %vm408_vm2, %v1113_v40 }
 0x609   :  { %3051 = vmatpush3.bf16.xpose.msra.mxu0 %v1364_v45  ;;  %3052 = vmatprep.mubr.msk.bf16.mxu0 %vm3498_vm1, %v3497_v12 }
 0x60a   :  { %3062 = vmatprep.subr.bf16.mxu0 %v3497_v12 }
 0x610   :  { %3053 = vmatmul.mubr.msk.bf16.vlgmr.msra.gmra.mrb[40].mxu0 %vm408_vm2, %v1357_v42 }
 0x611   :  { %3063 = vmatpush3.bf16.xpose.msra.mxu0 %v1464_v47  ;;  %3064 = vmatprep.mubr.msk.bf16.mxu0 %vm3498_vm1, %v3497_v12 }
 0x612   :  { %3074 = vmatprep.subr.bf16.mxu0 %v3497_v12 }
 0x618   :  { %3065 = vmatmul.mubr.msk.bf16.vlgmr.msra.gmra.mrb[44].mxu0 %vm408_vm2, %v1457_v50 }
 0x619   :  { %3076 = vmatprep.mubr.msk.bf16.mxu0 %vm3498_vm1, %v3497_v12 }
 0x672   :  { %v3944_v51 = vpop.f32.mrb[28].mxu1 }
 0x673   :  { %v3024_v54 = vpop.f32.mrb[29].mxu1 }
 0x674   :  { %v1159_v55 = vpop.f32.mrb[30].mxu1 }
 0x675   :  { %v3025_v56 = vpop.f32.mrb[31].mxu1 }
 0x6a6   :  { %v3946_v58 = vpop.f32.mrb[32].mxu0 }
 0x6a7   :  { %v3187_v59 = vpack.i.bf16 %v3946_v58, %v3944_v51  ;;  %v3950_v60 = vpop.f32.mrb[32].mxu1  ;;  %v3030_v61 = vpop.f32.mrb[33].mxu0 }
 0x6a8   :  { %v3036_v0 = vpop.f32.mrb[33].mxu1  ;;  %v1207_v1 = vpop.f32.mrb[34].mxu0 }
 0x6a9   :  { %v1255_v2 = vpop.f32.mrb[34].mxu1  ;;  %v3031_v4 = vpop.f32.mrb[35].mxu0 }
 0x6aa   :  { %v3037_v5 = vpop.f32.mrb[35].mxu1 }
 0x6af   :  { %v1350_v37 = vpop.f32.mrb[36].mxu1 }
 0x6b0   :  { %v1506_v7 = vmul.f32 0.35355338, %v1350_v37  ;;  %v3048_v41 = vpop.f32.mrb[37].mxu1 }
 0x6b1   :  { %v1353_v9 = vpop.f32.mrb[38].mxu1 }
 0x6b2   :  { %v3049_v10 = vpop.f32.mrb[39].mxu1  ;;  %v1510_v11 = vadd.f32 %v3778_v57, %v1506_v7 }
 0x6b4   :  { %v1514_v13 = vsel %vm408_vm2, %v1510_v11, -inf }
 0x6b5   :  { %1515 = vmax.xlane.f32.xlu0 %v1514_v13 }
 0x6b7   :  { %v1450_v14 = vpop.f32.mrb[40].mxu1 }
 0x6b8   :  { %v1508_v16 = vmul.f32 0.35355338, %v1450_v14  ;;  %v3060_v17 = vpop.f32.mrb[41].mxu1 }
 0x6b9   :  { %v1453_v18 = vpop.f32.mrb[42].mxu1 }
 0x6ba   :  { %v3061_v19 = vpop.f32.mrb[43].mxu1  ;;  %v1512_v20 = vadd.f32 %v3785_v8, %v1508_v16 }
 0x6bc   :  { %v1520_v21 = vsel %vm408_vm2, %v1512_v20, -inf }
 0x6bd   :  { %1521 = vmax.xlane.f32.xlu0 %v1520_v21 }
 0x6db   :  { %v3956_v23 = vpop.f32.mrb[36].mxu0 }
 0x6dc   :  { %v3192_v24 = vpack.i.bf16 %v3956_v23, %v3950_v60  ;;  %v3042_v25 = vpop.f32.mrb[37].mxu0 }
 0x6dd   :  { %v1303_v26 = vpop.f32.mrb[38].mxu0 }
 0x6de   :  { %v3043_v28 = vpop.f32.mrb[39].mxu0 }
 0x6e3   :  { %v1400_v29 = vpop.f32.mrb[40].mxu0 }
 0x6e4   :  { %v1507_v31 = vmul.f32 0.35355338, %v1400_v29  ;;  %v3054_v32 = vpop.f32.mrb[41].mxu0 }
 0x6e5   :  { %v1403_v35 = vpop.f32.mrb[42].mxu0 }
 0x6e6   :  { %v3055_v38 = vpop.f32.mrb[43].mxu0  ;;  %v1511_v40 = vadd.f32 %v3780_v62, %v1507_v31 }
 0x6e8   :  { %v1517_v42 = vsel %vm408_vm2, %v1511_v40, -inf }
 0x6e9   :  { %1518 = vmax.xlane.f32.xlu1 %v1517_v42 }
 0x6eb   :  { %v1500_v45 = vpop.f32.mrb[44].mxu0 }
 0x6ec   :  { %v1509_v46 = vmul.f32 0.35355338, %v1500_v45  ;;  %v3066_v47 = vpop.f32.mrb[45].mxu0 }
 0x6ed   :  { %v1503_v50 = vpop.f32.mrb[46].mxu0 }
 0x6ee   :  { %v3067_v54 = vpop.f32.mrb[47].mxu0  ;;  %v1513_v55 = vadd.f32 %v3788_v15, %v1509_v46 }
 0x6f0   :  { %v1523_v56 = vsel %vm408_vm2, %v1513_v55, -inf }
 0x6f1   :  { %1524 = vmax.xlane.f32.xlu0 %v1523_v56 }
 0x6fa   :  { %1610 = vrot.lane.b32.xlu1 %v3770_v53, %s3500_s5 }
 0x6fe   :  { %1658 = vrot.lane.b32.xlu1 %v3816_v63, %s3500_s5 }
 0x702   :  { %1706 = vrot.lane.b32.xlu1 %v3820_v3, %s3500_s5 }
 0x742   :  { %v1516_v61 = vpop.xlane.xlu0 %1515 }
 0x743   :  { %v1526_v0 = vsub.f32 %v1510_v11, %v1516_v61 }
 0x745   :  { %v1530_v1 = vmul.f32 1.442695, %v1526_v0 }
 0x747   :  { %3263 = vpow2.f32 %v1530_v1 }
 0x74a   :  { %v1522_v5 = vpop.xlane.xlu0 %1521 }
 0x74b   :  { %v1528_v37 = vsub.f32 %v1512_v20, %v1522_v5 }
 0x74d   :  { %v1534_v7 = vmul.f32 1.442695, %v1528_v37 }
 0x74f   :  { %3265 = vpow2.f32 %v1534_v7 }
 0x751   :  { %v3264_v2 = vpop.eup %3263 }
 0x752   :  { %v1538_v4 = vsel %vm408_vm2, %v3264_v2, 0.0 }
 0x753   :  { %1539 = vadd.xlane.f32.xlu0 %v1538_v4 }
 0x759   :  { %v3266_v14 = vpop.eup %3265 }
 0x75a   :  { %v1544_v18 = vsel %vm408_vm2, %v3266_v14, 0.0 }
 0x769   :  { %1562 = vrot.lane.b32.xlu0 %v3768_v52, %s3500_s5 }
 0x776   :  { %v1519_v41 = vpop.xlane.xlu1 %1518 }
 0x777   :  { %v1527_v9 = vsub.f32 %v1511_v40, %v1519_v41 }
 0x779   :  { %v1532_v10 = vmul.f32 1.442695, %v1527_v9 }
 0x77a   :  { %v1611_v13 = vpop.permute.xlu1 %1610 }
 0x77b   :  { %3267 = vpow2.f32 %v1532_v10  ;;  %v1616_v11 = vsel %vm676_vm3, %v1611_v13, 0 }
 0x77c   :  { %3075 = vmatpush3.bf16.msra.mxu0 %v1616_v11 }
 0x77d   :  { %3086 = vmatprep.subr.bf16.mxu0 %v3497_v12 }
 0x77e   :  { %v1525_v19 = vpop.xlane.xlu0 %1524  ;;  %v1659_v28 = vpop.permute.xlu1 %1658 }
 0x77f   :  { %v1529_v20 = vsub.f32 %v1513_v55, %v1525_v19 }
 0x781   :  { %v1536_v21 = vmul.f32 1.442695, %v1529_v20 }
 0x783   :  { %3269 = vpow2.f32 %v1536_v21 }
 0x785   :  { %v3268_v16 = vpop.eup %3267 }
 0x786   :  { %v1541_v17 = vsel %vm408_vm2, %v3268_v16, 0.0 }
 0x787   :  { %1542 = vadd.xlane.f32.xlu1 %v1541_v17 }
 0x788   :  { %1545 = vadd.xlane.f32.xlu0 %v1544_v18 }
 0x78d   :  { %v3270_v25 = vpop.eup %3269 }
 0x78e   :  { %v1547_v26 = vsel %vm408_vm2, %v3270_v25, 0.0 }
 0x798   :  { %1806 = vrot.lane.b32.xlu1 %v3722_v27, %s3501_s23 }
 0x79e   :  { %1756 = vrot.lane.b32.xlu0 %v3720_v22, %s3501_s23 }
 0x7a2   :  { %1754 = vrot.lane.b32.xlu0 %v3731_v34, %s3501_s23 }
 0x7a6   :  { %1856 = vrot.lane.b32.xlu0 %v3729_v33, %s3501_s23 }
 0x7aa   :  { %1854 = vrot.lane.b32.xlu0 %v3756_v48, %s3501_s23 }
 0x7bc   :  { %1548 = vadd.xlane.f32.xlu1 %v1547_v26 }
 0x7cd   :  { %1804 = vrot.lane.b32.xlu1 %v3740_v43, %s3501_s23  ;;  %v1664_v43 = vsel %vm676_vm3, %v1659_v28, 0 }
 0x7d1   :  { %1906 = vrot.lane.b32.xlu1 %v3736_v39, %s3501_s23  ;;  %v1707_v39 = vpop.permute.xlu1 %1706 }
 0x7d2   :  { %v1712_v47 = vsel %vm676_vm3, %v1707_v39, 0 }
 0x7d5   :  { %1904 = vrot.lane.b32.xlu1 %v3758_v49, %s3501_s23 }
 0x7e0   :  { %v1540_v22 = vpop.xlane.xlu0 %1539 }
 0x7e1   :  { %3271 = vrcp.f32 %v1540_v22 }
 0x7e4   :  { %v1563_v27 = vpop.permute.xlu0 %1562 }
 0x7e5   :  { %v1568_v33 = vsel %vm676_vm3, %v1563_v27, 0 }
 0x7e6   :  { %3069 = vmatpush3.bf16.msra.mxu1 %v1568_v33 }
 0x7e7   :  { %3080 = vmatprep.subr.bf16.mxu1 %v3497_v12 }
 0x7eb   :  { %v3272_v34 = vpop.eup %3271 }
 0x7ec   :  { %v1554_v48 = vmul.f32 %v3272_v34, %v3264_v2 }
 0x7ee   :  { %v1558_v29 = vpack.c.bf16 %v1554_v48, %v1554_v48 }
 0x7f0   :  { %3071 = vmatmul.mubr.msk.bf16.vlgmr.msra.gmra.mrb[44].mxu1 %vm408_vm2, %v1558_v29 }
 0x7f1   :  { %3081 = vmatpush3.bf16.msra.mxu1 %v1664_v43  ;;  %3082 = vmatprep.mubr.msk.bf16.mxu1 %vm3498_vm1, %v3497_v12 }
 0x7f2   :  { %3092 = vmatprep.subr.bf16.mxu1 %v3497_v12 }
 0x814   :  { %v1543_v49 = vpop.xlane.xlu1 %1542 }
 0x815   :  { %3273 = vrcp.f32 %v1543_v49  ;;  %v1546_v31 = vpop.xlane.xlu0 %1545 }
 0x816   :  { %3275 = vrcp.f32 %v1546_v31 }
 0x818   :  { %v1807_v0 = vpop.permute.xlu1 %1806 }
 0x819   :  { %v1757_v32 = vpop.permute.xlu0 %1756  ;;  %v1812_v7 = vsel %vm408_vm2, %v1807_v0, 0 }
 0x81a   :  { %v1762_v54 = vsel %vm408_vm2, %v1757_v32, 0 }
 0x81d   :  { %v1755_v50 = vpop.permute.xlu0 %1754 }
 0x81f   :  { %v3274_v35 = vpop.eup %3273 }
 0x820   :  { %v3276_v38 = vpop.eup %3275  ;;  %v1555_v40 = vmul.f32 %v3274_v35, %v3268_v16 }
 0x821   :  { %v1556_v42 = vmul.f32 %v3276_v38, %v3266_v14  ;;  %v1857_v55 = vpop.permute.xlu0 %1856 }
 0x822   :  { %v1559_v45 = vpack.c.bf16 %v1555_v40, %v1555_v40  ;;  %v1862_v56 = vsel %vm408_vm2, %v1857_v55, 0 }
 0x823   :  { %v1560_v46 = vpack.c.bf16 %v1556_v42, %v1556_v42 }
 0x824   :  { %3077 = vmatmul.mubr.msk.bf16.vlgmr.msra.gmra.mrb[48].mxu0 %vm408_vm2, %v1559_v45 }
 0x825   :  { %3083 = vmatmul.mubr.msk.bf16.vlgmr.msra.gmra.mrb[48].mxu1 %vm408_vm2, %v1560_v46  ;;  %3087 = vmatpush3.bf16.msra.mxu0 %v1712_v47  ;;  %v1855_v61 = vpop.permute.xlu0 %1854 }
 0x826   :  { %3093 = vmatpush3.bf16.xpose.msra.mxu1 %v1762_v54  ;;  %3094 = vmatprep.mubr.msk.bf16.mxu1 %vm3498_vm1, %v3497_v12 }
 0x827   :  { %3104 = vmatprep.subr.bf16.mxu1 %v3497_v12  ;;  %3088 = vmatprep.mubr.msk.bf16.mxu0 %vm3498_vm1, %v3497_v12 }
 0x828   :  { %3098 = vmatprep.subr.bf16.mxu0 %v3497_v12 }
 0x82d   :  { %3095 = vmatmul.mubr.msk.bf16.vlgmr.msra.gmra.mrb[52].mxu1 %vm408_vm2, %v1755_v50 }
 0x82e   :  { %3105 = vmatpush3.bf16.xpose.msra.mxu1 %v1862_v56  ;;  %3106 = vmatprep.mubr.msk.bf16.mxu1 %vm3498_vm1, %v3497_v12 }
 0x82f   :  { %3116 = vmatprep.subr.bf16.mxu1 %v3497_v12 }
 0x835   :  { %3107 = vmatmul.mubr.msk.bf16.vlgmr.msra.gmra.mrb[56].mxu1 %vm408_vm2, %v1855_v61 }
 0x836   :  { %3118 = vmatprep.mubr.msk.bf16.mxu1 %vm3498_vm1, %v3497_v12 }
 0x849   :  { %v1549_v1 = vpop.xlane.xlu1 %1548 }
 0x84a   :  { %3277 = vrcp.f32 %v1549_v1 }
 0x84d   :  { %v1805_v37 = vpop.permute.xlu1 %1804 }
 0x851   :  { %v1907_v41 = vpop.permute.xlu1 %1906 }
 0x852   :  { %v1912_v9 = vsel %vm408_vm2, %v1907_v41, 0 }
 0x854   :  { %v3278_v2 = vpop.eup %3277 }
 0x855   :  { %v1557_v4 = vmul.f32 %v3278_v2, %v3270_v25  ;;  %v1905_v10 = vpop.permute.xlu1 %1904 }
 0x857   :  { %v1561_v5 = vpack.c.bf16 %v1557_v4, %v1557_v4 }
 0x859   :  { %3089 = vmatmul.mubr.msk.bf16.vlgmr.msra.gmra.mrb[52].mxu0 %vm408_vm2, %v1561_v5 }
 0x85a   :  { %3099 = vmatpush3.bf16.xpose.msra.mxu0 %v1812_v7  ;;  %3100 = vmatprep.mubr.msk.bf16.mxu0 %vm3498_vm1, %v3497_v12 }
 0x85b   :  { %3110 = vmatprep.subr.bf16.mxu0 %v3497_v12 }
 0x861   :  { %3101 = vmatmul.mubr.msk.bf16.vlgmr.msra.gmra.mrb[56].mxu0 %vm408_vm2, %v1805_v37 }
 0x862   :  { %3111 = vmatpush3.bf16.xpose.msra.mxu0 %v1912_v9  ;;  %3112 = vmatprep.mubr.msk.bf16.mxu0 %vm3498_vm1, %v3497_v12 }
 0x863   :  { %3122 = vmatprep.subr.bf16.mxu0 %v3497_v12 }
 0x869   :  { %3113 = vmatmul.mubr.msk.bf16.vlgmr.msra.gmra.mrb[60].mxu0 %vm408_vm2, %v1905_v10 }
 0x86a   :  { %3124 = vmatprep.mubr.msk.bf16.mxu0 %vm3498_vm1, %v3497_v12 }
 0x8c3   :  { %v4032_v13 = vpop.f32.mrb[44].mxu1 }
 0x8c4   :  { %v3072_v11 = vpop.f32.mrb[45].mxu1 }
 0x8c5   :  { %v1607_v14 = vpop.f32.mrb[46].mxu1 }
 0x8c6   :  { %v3073_v16 = vpop.f32.mrb[47].mxu1 }
 0x8f7   :  { %v4034_v17 = vpop.f32.mrb[48].mxu0 }
 0x8f8   :  { %v3197_v18 = vpack.i.bf16 %v4034_v17, %v4032_v13  ;;  %v4038_v19 = vpop.f32.mrb[48].mxu1  ;;  %v3078_v20 = vpop.f32.mrb[49].mxu0 }
 0x8f9   :  { %v3084_v21 = vpop.f32.mrb[49].mxu1  ;;  %v1655_v25 = vpop.f32.mrb[50].mxu0 }
 0x8fa   :  { %v1703_v26 = vpop.f32.mrb[50].mxu1  ;;  %v3079_v22 = vpop.f32.mrb[51].mxu0 }
 0x8fb   :  { %v3085_v27 = vpop.f32.mrb[51].mxu1 }
 0x900   :  { %v1798_v33 = vpop.f32.mrb[52].mxu1 }
 0x901   :  { %v1954_v34 = vmul.f32 0.35355338, %v1798_v33  ;;  %v3096_v48 = vpop.f32.mrb[53].mxu1 }
 0x902   :  { %v1801_v28 = vpop.f32.mrb[54].mxu1 }
 0x903   :  { %v3097_v29 = vpop.f32.mrb[55].mxu1  ;;  %v1958_v43 = vadd.f32 %v3778_v57, %v1954_v34 }
 0x905   :  { %v1962_v39 = vsel %vm408_vm2, %v1958_v43, -inf }
 0x906   :  { %1963 = vmax.xlane.f32.xlu0 %v1962_v39 }
 0x908   :  { %v1898_v49 = vpop.f32.mrb[56].mxu1 }
 0x909   :  { %v1956_v31 = vmul.f32 0.35355338, %v1898_v49  ;;  %v3108_v32 = vpop.f32.mrb[57].mxu1 }
 0x90a   :  { %v1901_v35 = vpop.f32.mrb[58].mxu1 }
 0x90b   :  { %v3109_v38 = vpop.f32.mrb[59].mxu1  ;;  %v1960_v40 = vadd.f32 %v3785_v8, %v1956_v31 }
 0x90d   :  { %v1968_v42 = vsel %vm408_vm2, %v1960_v40, -inf }
 0x90e   :  { %1969 = vmax.xlane.f32.xlu0 %v1968_v42 }
 0x92c   :  { %v1748_v45 = vpop.f32.mrb[52].mxu0 }
 0x92d   :  { %v3202_v46 = vpack.i.bf16 %v1748_v45, %v4038_v19  ;;  %v3090_v47 = vpop.f32.mrb[53].mxu0 }
 0x92e   :  { %v1751_v50 = vpop.f32.mrb[54].mxu0 }
 0x92f   :  { %v3091_v54 = vpop.f32.mrb[55].mxu0 }
 0x934   :  { %v1848_v57 = vpop.f32.mrb[56].mxu0 }
 0x935   :  { %v1955_v55 = vmul.f32 0.35355338, %v1848_v57  ;;  %v3102_v56 = vpop.f32.mrb[57].mxu0 }
 0x936   :  { %v1851_v61 = vpop.f32.mrb[58].mxu0 }
 0x937   :  { %v3103_v0 = vpop.f32.mrb[59].mxu0  ;;  %v1959_v1 = vadd.f32 %v3780_v62, %v1955_v55  ;;  %v3223_v61 = vld [vmem:[#allocation10] sm:$0xff]  }
 0x939   :  { %v1965_v2 = vsel %vm408_vm2, %v1959_v1, -inf }
 0x93a   :  { %1966 = vmax.xlane.f32.xlu1 %v1965_v2 }
 0x93c   :  { %v1948_v8 = vpop.f32.mrb[60].mxu0 }
 0x93d   :  { %v1957_v4 = vmul.f32 0.35355338, %v1948_v8  ;;  %v3114_v5 = vpop.f32.mrb[61].mxu0 }
 0x93e   :  { %v1951_v37 = vpop.f32.mrb[62].mxu0 }
 0x93f   :  { %v3115_v7 = vpop.f32.mrb[63].mxu0  ;;  %v1961_v41 = vadd.f32 %v3788_v15, %v1957_v4 }
 0x941   :  { %v1971_v9 = vsel %vm408_vm2, %v1961_v41, -inf }
 0x942   :  { %1972 = vmax.xlane.f32.xlu0 %v1971_v9 }
 0x993   :  { %v1964_v10 = vpop.xlane.xlu0 %1963 }
 0x994   :  { %v1974_v11 = vsub.f32 %v1958_v43, %v1964_v10 }
 0x996   :  { %v1978_v14 = vmul.f32 1.442695, %v1974_v11 }
 0x998   :  { %3279 = vpow2.f32 %v1978_v14 }
 0x99b   :  { %v1970_v16 = vpop.xlane.xlu0 %1969 }
 0x99c   :  { %v1976_v19 = vsub.f32 %v1960_v40, %v1970_v16 }
 0x99e   :  { %v1982_v62 = vmul.f32 1.442695, %v1976_v19 }
 0x9a0   :  { %3281 = vpow2.f32 %v1982_v62 }
 0x9a2   :  { %v3280_v20 = vpop.eup %3279 }
 0x9a3   :  { %v1986_v21 = vsel %vm408_vm2, %v3280_v20, 0.0 }
 0x9a4   :  { %1987 = vadd.xlane.f32.xlu0 %v1986_v21 }
 0x9aa   :  { %v3282_v25 = vpop.eup %3281 }
 0x9ab   :  { %v1992_v26 = vsel %vm408_vm2, %v3282_v25, 0.0 }
 0x9ac   :  { %1993 = vadd.xlane.f32.xlu0 %v1992_v26 }
 0x9c2   :  { %2010 = vrot.lane.b32.xlu0 %v3768_v52, %s3501_s23 }
 0x9c6   :  { %3188 = vrot.lane.b32.xlu0 %v3187_v59, %s3502_s29 }
 0x9c7   :  { %v1967_v15 = vpop.xlane.xlu1 %1966 }
 0x9c8   :  { %v1975_v22 = vsub.f32 %v1959_v1, %v1967_v15 }
 0x9ca   :  { %v1980_v27 = vmul.f32 1.442695, %v1975_v22  ;;  %3198 = vrot.lane.b32.xlu0 %v3197_v18, %s3492_s7 }
 0x9cc   :  { %3283 = vpow2.f32 %v1980_v27 }
 0x9cf   :  { %v1973_v52 = vpop.xlane.xlu0 %1972 }
 0x9d0   :  { %v1977_v51 = vsub.f32 %v1961_v41, %v1973_v52  ;;  %v3224_v41 = vld [vmem:[#allocation10 + $0x8] sm:$0xff]  }
 0x9d2   :  { %v1984_v58 = vmul.f32 1.442695, %v1977_v51 }
 0x9d4   :  { %3285 = vpow2.f32 %v1984_v58 }
 0x9d6   :  { %v3284_v33 = vpop.eup %3283 }
 0x9d7   :  { %v1989_v34 = vsel %vm408_vm2, %v3284_v33, 0.0 }
 0x9d8   :  { %1990 = vadd.xlane.f32.xlu1 %v1989_v34 }
 0x9de   :  { %v3286_v59 = vpop.eup %3285 }
 0x9df   :  { %v1995_v48 = vsel %vm408_vm2, %v3286_v59, 0.0 }
 0x9e9   :  { %2058 = vrot.lane.b32.xlu1 %v3770_v53, %s3501_s23 }
 0x9ed   :  { %2106 = vrot.lane.b32.xlu1 %v3816_v63, %s3501_s23 }
 0xa11   :  { %1996 = vadd.xlane.f32.xlu1 %v1995_v48 }
 0xa22   :  { %2154 = vrot.lane.b32.xlu1 %v3820_v3, %s3501_s23 }
 0xa26   :  { %3193 = vrot.lane.b32.xlu1 %v3192_v24, %s3502_s29 }
 0xa2a   :  { %3203 = vrot.lane.b32.xlu1 %v3202_v46, %s3492_s7  ;;  %s3503_s7 = smov 24  }
 0xa31   :  { %v1988_v53 = vpop.xlane.xlu0 %1987 }
 0xa32   :  { %3287 = vrcp.f32 %v1988_v53 }
 0xa39   :  { %v1994_v63 = vpop.xlane.xlu0 %1993 }
 0xa3a   :  { %3289 = vrcp.f32 %v1994_v63 }
 0xa3c   :  { %v3288_v13 = vpop.eup %3287 }
 0xa3d   :  { %v2002_v17 = vmul.f32 %v3288_v13, %v3280_v20  ;;  %v2011_v18 = vpop.permute.xlu0 %2010 }
 0xa3e   :  { %v2016_v28 = vsel %vm676_vm3, %v2011_v18, 0 }
 0xa3f   :  { %3117 = vmatpush3.bf16.msra.mxu1 %v2016_v28  ;;  %v2006_v29 = vpack.c.bf16 %v2002_v17, %v2002_v17 }
 0xa40   :  { %3128 = vmatprep.subr.bf16.mxu1 %v3497_v12 }
 0xa41   :  { %v3189_v19 = vpop.permute.xlu0 %3188 }
 0xa42   :  { %3119 = vmatmul.mubr.msk.bf16.vlgmr.msra.gmra.mrb[60].mxu1 %vm408_vm2, %v2006_v29  ;;  %v3191_v20 = vunpack.i.h.bf16 %v3189_v19  ;;  %v3190_v21 = vunpack.i.l.bf16 %v3189_v19 }
 0xa43   :  { %3130 = vmatprep.mubr.msk.bf16.mxu1 %vm3498_vm1, %v3497_v12 }
 0xa44   :  { %v3290_v60 = vpop.eup %3289  ;;  %v2251_v22 = vsel %vm408_vm2, %v3862_v36, %v3191_v20  ;;  %v2250_v27 = vsel %vm408_vm2, %v3860_v30, %v3190_v21 }
 0xa45   :  { %v2004_v43 = vmul.f32 %v3290_v60, %v3282_v25  ;;  %v3199_v62 = vpop.permute.xlu0 %3198 }
 0xa46   :  { %v3201_v25 = vunpack.i.h.bf16 %v3199_v62  ;;  %v3200_v26 = vunpack.i.l.bf16 %v3199_v62 }
 0xa47   :  { %v2008_v32 = vpack.c.bf16 %v2004_v43, %v2004_v43 }
 0xa48   :  { %v2255_v52 = vsel %vm2254_vm4, %v2250_v27, %v3200_v26  ;;  %v2256_v51 = vsel %vm2254_vm4, %v2251_v22, %v3201_v25 }
 0xa65   :  { %v1991_v3 = vpop.xlane.xlu1 %1990 }
 0xa66   :  { %3291 = vrcp.f32 %v1991_v3 }
 0xa69   :  { %v2059_v23 = vpop.permute.xlu1 %2058 }
 0xa6a   :  { %v2064_v24 = vsel %vm676_vm3, %v2059_v23, 0 }
 0xa6b   :  { %3123 = vmatpush3.bf16.msra.mxu0 %v2064_v24 }
 0xa6c   :  { %3134 = vmatprep.subr.bf16.mxu0 %v3497_v12 }
 0xa6d   :  { %v2107_v39 = vpop.permute.xlu1 %2106 }
 0xa6e   :  { %v2112_v49 = vsel %vm676_vm3, %v2107_v39, 0 }
 0xa6f   :  { %3129 = vmatpush3.bf16.msra.mxu1 %v2112_v49 }
 0xa70   :  { %v3292_v31 = vpop.eup %3291  ;;  %3140 = vmatprep.subr.bf16.mxu1 %v3223_v61 }
 0xa71   :  { %v2003_v35 = vmul.f32 %v3292_v31, %v3284_v33  ;;  %v2801_v31 = vld [vmem:[#allocation11] ss:$0 sm:$0xff] }
 0xa72   :  { %3131 = vmatmul.mubr.msk.bf16.vlgmr.msra.gmra.mrb[64].mxu1 %vm408_vm2, %v2008_v32 }
 0xa73   :  { %v2007_v38 = vpack.c.bf16 %v2003_v35, %v2003_v35  ;;  %3141 = vmatpush3.bf16.msra.mxu1 %v3223_v61 }
 0xa74   :  { %3142 = vmatprep.subr.bf16.mxu1 %v3224_v41 }
 0xa75   :  { %3125 = vmatmul.mubr.msk.bf16.vlgmr.msra.gmra.mrb[64].mxu0 %vm408_vm2, %v2007_v38 }
 0xa76   :  { %3136 = vmatprep.mubr.msk.bf16.mxu0 %vm3498_vm1, %v3497_v12 }
 0xa77   :  { %3143 = vmatpush3.bf16.msra.mxu1 %v3224_v41 }
 0xa9e   :  { %v1997_v40 = vpop.xlane.xlu1 %1996 }
 0xa9f   :  { %3293 = vrcp.f32 %v1997_v40 }
 0xaa2   :  { %v2155_v42 = vpop.permute.xlu1 %2154 }
 0xaa3   :  { %v2160_v45 = vsel %vm676_vm3, %v2155_v42, 0 }
 0xaa4   :  { %3135 = vmatpush3.bf16.msra.mxu0 %v2160_v45  ;;  %v3319_v45 = vld [vmem:[%s4237_s25] sm:$0xff] }
 0xaa6   :  { %v3194_v53 = vpop.permute.xlu1 %3193 }
 0xaa7   :  { %v3196_v13 = vunpack.i.h.bf16 %v3194_v53  ;;  %v3195_v36 = vunpack.i.l.bf16 %v3194_v53 }
 0xaa9   :  { %v3294_v46 = vpop.eup %3293  ;;  %v2253_v28 = vsel %vm408_vm2, %v3870_v6, %v3196_v13  ;;  %v2252_v29 = vsel %vm408_vm2, %v3864_v44, %v3195_v36 }
 0xaaa   :  { %v2005_v47 = vmul.f32 %v3294_v46, %v3286_v59  ;;  %v3204_v63 = vpop.permute.xlu1 %3203 }
 0xaab   :  { %v3206_v17 = vunpack.i.h.bf16 %v3204_v63  ;;  %v3205_v18 = vunpack.i.l.bf16 %v3204_v63 }
 0xaac   :  { %v2009_v50 = vpack.c.bf16 %v2005_v47, %v2005_v47 }
 0xaad   :  { %v2257_v23 = vsel %vm2254_vm4, %v2252_v29, %v3205_v18  ;;  %v2258_v24 = vsel %vm2254_vm4, %v2253_v28, %v3206_v17  ;;  %v2806_v29 = vld [vmem:[%s4215_s10] ss:$0 sm:$0xff] }
 0xaae   :  { %3137 = vmatmul.mubr.msk.bf16.vlgmr.msra.gmra.mrb[68].mxu0 %vm408_vm2, %v2009_v50 }
 0xb15   :  { %v2052_v54 = vpop.f32.mrb[60].mxu1 }
 0xb16   :  { %v3120_v57 = vpop.f32.mrb[61].mxu1 }
 0xb17   :  { %v2055_v55 = vpop.f32.mrb[62].mxu1 }
 0xb18   :  { %v3121_v56 = vpop.f32.mrb[63].mxu1  ;;  %v3321_v55 = vld [vmem:[%s4237_s25 + $0x10] sm:$0xff] }
 0xb45   :  { %v2148_v0 = vpop.f32.mrb[64].mxu1 }
 0xb46   :  { %v3132_v1 = vpop.f32.mrb[65].mxu1 }
 0xb47   :  { %v2151_v12 = vpop.f32.mrb[66].mxu1  ;;  %v3322_v1 = vld [vmem:[%s4237_s25 + $0x18] sm:$0xff] }
 0xb48   :  { %v2100_v2 = vpop.f32.mrb[64].mxu0  ;;  %v3133_v8 = vpop.f32.mrb[67].mxu1 }
 0xb49   :  { %v3207_v4 = vpack.i.bf16 %v2100_v2, %v2052_v54  ;;  %v3126_v5 = vpop.f32.mrb[65].mxu0  ;;  %v3320_v54 = vld [vmem:[%s4237_s25 + $0x8] sm:$0xff] }
 0xb4a   :  { %v2103_v37 = vpop.f32.mrb[66].mxu0 }
 0xb4b   :  { %v3127_v7 = vpop.f32.mrb[67].mxu0  ;;  %3208 = vrot.lane.b32.xlu0 %v3207_v4, %s3503_s7 }
 0xb81   :  { %v2196_v9 = vpop.f32.mrb[68].mxu0 }
 0xb82   :  { %v3212_v10 = vpack.i.bf16 %v2196_v9, %v2148_v0  ;;  %v3138_v11 = vpop.f32.mrb[69].mxu0 }
 0xb83   :  { %v2199_v14 = vpop.f32.mrb[70].mxu0 }
 0xb84   :  { %v3139_v16 = vpop.f32.mrb[71].mxu0  ;;  %3213 = vrot.lane.b32.xlu1 %v3212_v10, %s3503_s7 }
 0xbbd   :  { %v3209_v15 = vpop.permute.xlu0 %3208 }
 0xbbe   :  { %v3211_v33 = vunpack.i.h.bf16 %v3209_v15  ;;  %v3210_v34 = vunpack.i.l.bf16 %v3209_v15 }
 0xbc0   :  { %v2261_v58 = vsel %vm2259_vm5, %v2256_v51, %v3211_v33  ;;  %v2260_v59 = vsel %vm2259_vm5, %v2255_v52, %v3210_v34  ;;  %v3225_v33 = vld [vmem:[%s4217_s12] sm:$0xff]   ;;  %v3226_v34 = vld [vmem:[%s4217_s12 + $0x8] sm:$0xff]  }
 0xbc1   :  { %v2264_v48 = vpack.c.bf16 %v2261_v58, %v2260_v59  ;;  %3148 = vmatprep.subr.bf16.mxu0 %v3225_v33 }
 0xbc2   :  { %3149 = vmatpush3.bf16.msra.mxu0 %v3225_v33 }
 0xbc3   :  { %3144 = vmatprep.mubr.msk.bf16.mxu1 %vm168_vm0, %v2264_v48  ;;  %3150 = vmatprep.subr.bf16.mxu0 %v3226_v34 }
 0xbc6   :  { %3151 = vmatpush3.bf16.msra.mxu0 %v3226_v34 }
 0xbf6   :  { %v3214_v30 = vpop.permute.xlu1 %3213 }
 0xbf7   :  { %v3216_v3 = vunpack.i.h.bf16 %v3214_v30  ;;  %v3215_v60 = vunpack.i.l.bf16 %v3214_v30 }
 0xbf9   :  { %v2263_v43 = vsel %vm2259_vm5, %v2258_v24, %v3216_v3  ;;  %v2262_v39 = vsel %vm2259_vm5, %v2257_v23, %v3215_v60 }
 0xbfa   :  { %v2265_v49 = vpack.c.bf16 %v2263_v43, %v2262_v39  ;;  %v2807_v39 = vld [vmem:[%s4216_s11] ss:$0 sm:$0xff] }
 0xbfc   :  { %3145 = vmatmul.mubr.msk.bf16.vlgmr.msra.gmra.mrb[68].mxu1 %vm168_vm0, %v2265_v49 }
 0xccf   :  { %v3146_v32 = vpop.f32.mrb[68].mxu1 }
 0xcd0   :  { %v2329_v35 = vpop.f32.mrb[69].mxu1  ;;  %v2338_v6 = vadd.f32 %v3146_v32, %v2801_v31 }
 0xcd1   :  { %v2330_v38 = vadd.f32 %v2801_v31, %v2329_v35  ;;  %v3147_v40 = vpop.f32.mrb[70].mxu1 }
 0xcd2   :  { %v2332_v44 = vpop.f32.mrb[71].mxu1  ;;  %v2341_v47 = vadd.f32 %v3147_v40, %v2801_v31  ;;  %v2346_v56 = vadd.f32 %v3321_v55, %v2338_v6  ;;  %v3230_v55 = vld [vmem:[%s4219_s14 + $0x18] sm:$0xff]  }
 0xcd3   :  { %v2333_v42 = vadd.f32 %v2801_v31, %v2332_v44  ;;  %v2344_v46 = vadd.f32 %v3319_v45, %v2330_v38 }
 0xcd4   :  { %v2356_v0 = vsel %vm168_vm0, %v2346_v56, 0.0  ;;  %v2347_v12 = vadd.f32 %v3322_v1, %v2341_v47 }
 0xcd5   :  { %v2350_v50 = vsel %vm168_vm0, %v2344_v46, 0.0  ;;  %v2345_v57 = vadd.f32 %v3320_v54, %v2333_v42  ;;  %v3228_v54 = vld [vmem:[%s4219_s14 + $0x8] sm:$0xff]  }
 0xcd6   :  { %2351 = vadd.xlane.f32.xlu0 %v2350_v50  ;;  %v2359_v2 = vsel %vm168_vm0, %v2347_v12, 0.0  ;;  %v3227_v50 = vld [vmem:[%s4219_s14] sm:$0xff]  }
 0xcd7   :  { %v2353_v61 = vsel %vm168_vm0, %v2345_v57, 0.0  ;;  %3156 = vmatprep.subr.bf16.mxu1 %v3227_v50 }
 0xcd8   :  { %2354 = vadd.xlane.f32.xlu1 %v2353_v61  ;;  %3157 = vmatpush3.bf16.msra.mxu1 %v3227_v50 }
 0xcd9   :  { %3158 = vmatprep.subr.bf16.mxu1 %v3228_v54 }
 0xcda   :  { %2357 = vadd.xlane.f32.xlu0 %v2356_v0 }
 0xcdc   :  { %3159 = vmatpush3.bf16.msra.mxu1 %v3228_v54 }
 0xcde   :  { %2360 = vadd.xlane.f32.xlu0 %v2359_v2 }
 0xd63   :  { %v2352_v8 = vpop.xlane.xlu0 %2351 }
 0xd64   :  { %v2363_v4 = vmul.f32 0.03125, %v2352_v8 }
 0xd65   :  { %v2355_v5 = vpop.xlane.xlu1 %2354 }
 0xd66   :  { %v2367_v37 = vsub.f32 %v2344_v46, %v2363_v4  ;;  %v2364_v7 = vmul.f32 0.03125, %v2355_v5 }
 0xd67   :  { %v2358_v41 = vpop.xlane.xlu0 %2357 }
 0xd68   :  { %v2368_v9 = vsub.f32 %v2345_v57, %v2364_v7  ;;  %v2365_v10 = vmul.f32 0.03125, %v2358_v41  ;;  %v2371_v11 = vmul.f32 %v2367_v37, %v2367_v37  ;;  %v3229_v57 = vld [vmem:[%s4219_s14 + $0x10] sm:$0xff]  }
 0xd69   :  { %3160 = vmatprep.subr.bf16.mxu1 %v3229_v57 }
 0xd6a   :  { %v2369_v14 = vsub.f32 %v2346_v56, %v2365_v10  ;;  %v2375_v16 = vsel %vm168_vm0, %v2371_v11, 0.0  ;;  %v2372_v19 = vmul.f32 %v2368_v9, %v2368_v9  ;;  %3161 = vmatpush3.bf16.msra.mxu1 %v3229_v57  ;;  %v2808_v56 = vld [vmem:[%s4218_s13] ss:$0 sm:$0xff] }
 0xd6b   :  { %2376 = vadd.xlane.f32.xlu0 %v2375_v16  ;;  %v2361_v62 = vpop.xlane.xlu0 %2360  ;;  %3162 = vmatprep.subr.bf16.mxu1 %v3230_v55 }
 0xd6c   :  { %v2366_v20 = vmul.f32 0.03125, %v2361_v62  ;;  %v2378_v21 = vsel %vm168_vm0, %v2372_v19, 0.0  ;;  %v2373_v25 = vmul.f32 %v2369_v14, %v2369_v14 }
 0xd6d   :  { %2379 = vadd.xlane.f32.xlu1 %v2378_v21 }
 0xd6e   :  { %v2370_v26 = vsub.f32 %v2347_v12, %v2366_v20  ;;  %v2381_v15 = vsel %vm168_vm0, %v2373_v25, 0.0  ;;  %3163 = vmatpush3.bf16.msra.mxu1 %v3230_v55 }
 0xd6f   :  { %2382 = vadd.xlane.f32.xlu0 %v2381_v15 }
 0xd70   :  { %v2374_v22 = vmul.f32 %v2370_v26, %v2370_v26 }
 0xd72   :  { %v2384_v27 = vsel %vm168_vm0, %v2374_v22, 0.0 }
 0xd73   :  { %2385 = vadd.xlane.f32.xlu1 %v2384_v27 }
 0xdf8   :  { %v2377_v52 = vpop.xlane.xlu0 %2376 }
 0xdf9   :  { %v2387_v51 = vmul.f32 0.03125, %v2377_v52 }
 0xdfa   :  { %v2380_v58 = vpop.xlane.xlu1 %2379 }
 0xdfb   :  { %v2391_v59 = vadd.f32 1e-12, %v2387_v51  ;;  %v2388_v48 = vmul.f32 0.03125, %v2380_v58 }
 0xdfc   :  { %v2383_v53 = vpop.xlane.xlu0 %2382 }
 0xdfd   :  { %3295 = vrsqrt.f32 %v2391_v59  ;;  %v2392_v63 = vadd.f32 1e-12, %v2388_v48  ;;  %v2389_v13 = vmul.f32 0.03125, %v2383_v53 }
 0xdff   :  { %3297 = vrsqrt.f32 %v2392_v63  ;;  %v2393_v36 = vadd.f32 1e-12, %v2389_v13 }
 0xe00   :  { %v2386_v17 = vpop.xlane.xlu1 %2385 }
 0xe01   :  { %3299 = vrsqrt.f32 %v2393_v36  ;;  %v2390_v18 = vmul.f32 0.03125, %v2386_v17 }
 0xe03   :  { %v2394_v30 = vadd.f32 1e-12, %v2390_v18 }
 0xe05   :  { %3301 = vrsqrt.f32 %v2394_v30 }
 0xe07   :  { %v3296_v28 = vpop.eup %3295 }
 0xe08   :  { %v2399_v3 = vmul.f32 %v3296_v28, %v2367_v37 }
 0xe09   :  { %v3298_v60 = vpop.eup %3297 }
 0xe0a   :  { %v2400_v23 = vmul.f32 %v3298_v60, %v2368_v9  ;;  %v2409_v24 = vmul.f32 %v2806_v29, %v2399_v3 }
 0xe0b   :  { %v3300_v43 = vpop.eup %3299 }
 0xe0c   :  { %v2401_v49 = vmul.f32 %v3300_v43, %v2369_v14  ;;  %v2410_v31 = vmul.f32 %v2806_v29, %v2400_v23  ;;  %v4138_v32 = vadd.f32 %v2807_v39, %v2409_v24 }
 0xe0e   :  { %v4140_v35 = vadd.f32 %v2807_v39, %v2410_v31  ;;  %v2411_v38 = vmul.f32 %v2806_v29, %v2401_v49 }
 0xe0f   :  { %v3302_v6 = vpop.eup %3301 }
 0xe10   :  { %v2402_v40 = vmul.f32 %v3302_v6, %v2370_v26  ;;  %v2423_v44 = vpack.c.bf16 %v4140_v35, %v4138_v32  ;;  %v4145_v45 = vadd.f32 %v2807_v39, %v2411_v38 }
 0xe12   :  { %v2412_v42 = vmul.f32 %v2806_v29, %v2402_v40  ;;  %3152 = vmatprep.mubr.msk.bf16.mxu0 %vm168_vm0, %v2423_v44 }
 0xe14   :  { %v4147_v46 = vadd.f32 %v2807_v39, %v2412_v42  ;;  %v2813_v39 = vld [vmem:[%s4220_s15] ss:$0 sm:$0xff] }
 0xe16   :  { %v2424_v47 = vpack.c.bf16 %v4147_v46, %v4145_v45 }
 0xe18   :  { %3153 = vmatmul.mubr.msk.bf16.vlgmr.msra.gmra.mrb[72].mxu0 %vm168_vm0, %v2424_v47 }
 0xeeb   :  { %v3154_v61 = vpop.f32.mrb[72].mxu0 }
 0xeec   :  { %v2497_v0 = vadd.f32 %v3154_v61, %v2808_v56  ;;  %v2488_v1 = vpop.f32.mrb[73].mxu0 }
 0xeed   :  { %v2489_v12 = vadd.f32 %v2808_v56, %v2488_v1  ;;  %v3155_v2 = vpop.f32.mrb[74].mxu0 }
 0xeee   :  { %v2509_v8 = vmul.f32 0.044715, %v2497_v0  ;;  %v2500_v4 = vadd.f32 %v3155_v2, %v2808_v56  ;;  %v2491_v5 = vpop.f32.mrb[75].mxu0  ;;  %v2505_v13 = vmul.f32 0.5, %v2497_v0 }
 0xeef   :  { %v2507_v37 = vmul.f32 0.044715, %v2489_v12  ;;  %v2492_v7 = vadd.f32 %v2808_v56, %v2491_v5  ;;  %v2503_v18 = vmul.f32 0.5, %v2489_v12 }
 0xef0   :  { %v2513_v41 = vmul.f32 %v2509_v8, %v2497_v0  ;;  %v2510_v9 = vmul.f32 0.044715, %v2500_v4  ;;  %v2506_v36 = vmul.f32 0.5, %v2500_v4 }
 0xef1   :  { %v2511_v10 = vmul.f32 %v2507_v37, %v2489_v12  ;;  %v2508_v11 = vmul.f32 0.044715, %v2492_v7  ;;  %v2504_v30 = vmul.f32 0.5, %v2492_v7 }
 0xef2   :  { %v2517_v14 = vmul.f32 %v2513_v41, %v2497_v0  ;;  %v2514_v16 = vmul.f32 %v2510_v9, %v2500_v4 }
 0xef3   :  { %v2515_v19 = vmul.f32 %v2511_v10, %v2489_v12  ;;  %v2512_v62 = vmul.f32 %v2508_v11, %v2492_v7 }
 0xef4   :  { %v2521_v20 = vadd.f32 %v2517_v14, %v2497_v0  ;;  %v2518_v21 = vmul.f32 %v2514_v16, %v2500_v4 }
 0xef5   :  { %v2519_v25 = vadd.f32 %v2515_v19, %v2489_v12  ;;  %v2516_v26 = vmul.f32 %v2512_v62, %v2492_v7 }
 0xef6   :  { %v2525_v15 = vmul.f32 0.7978846, %v2521_v20  ;;  %v2522_v22 = vadd.f32 %v2518_v21, %v2500_v4 }
 0xef7   :  { %v2523_v27 = vmul.f32 0.7978846, %v2519_v25  ;;  %v2520_v33 = vadd.f32 %v2516_v26, %v2492_v7 }
 0xef8   :  { %3303 = vtanh.f32 %v2525_v15  ;;  %v2526_v34 = vmul.f32 0.7978846, %v2522_v22 }
 0xef9   :  { %3305 = vtanh.f32 %v2523_v27  ;;  %v2524_v52 = vmul.f32 0.7978846, %v2520_v33 }
 0xefa   :  { %3307 = vtanh.f32 %v2526_v34 }
 0xefb   :  { %3309 = vtanh.f32 %v2524_v52 }
 0xf02   :  { %v3304_v51 = vpop.eup %3303 }
 0xf03   :  { %v3306_v58 = vpop.eup %3305  ;;  %v2533_v59 = vadd.f32 1.0, %v3304_v51 }
 0xf04   :  { %v3308_v48 = vpop.eup %3307  ;;  %v2531_v53 = vadd.f32 1.0, %v3306_v58 }
 0xf05   :  { %v3310_v63 = vpop.eup %3309  ;;  %v2534_v17 = vadd.f32 1.0, %v3308_v48  ;;  %v2537_v29 = vmul.f32 %v2533_v59, %v2505_v13 }
 0xf06   :  { %v2532_v28 = vadd.f32 1.0, %v3310_v63  ;;  %v2535_v60 = vmul.f32 %v2531_v53, %v2503_v18  ;;  %v2820_v53 = vld [vmem:[%s4221_s16] ss:$0 sm:$0xff]  ;;  %s2723_s16 = sshll.u32 %s3504_s6, 4  ;;  %s2724_s16 = int_to_ptr.vmem [resolvable:$true] %s2723_s16 }
 0xf07   :  { %v2538_v3 = vmul.f32 %v2534_v17, %v2506_v36  ;;  %v2821_v36 = vld [vmem:[%s4222_s17] ss:$0 sm:$0xff]  ;;  %s3455_s17 = scalar_lea.vmem %s2724_s16, 512  ;;  %p3460_p7 = scmp.lt.s32.totalorder %s2724_s16, %s2724_s16 }
 0xf08   :  { %v2536_v23 = vmul.f32 %v2532_v28, %v2504_v30  ;;  %p3456_p6 = scmp.ne.s32.totalorder %s2724_s16, %s3455_s17  ;;  %p3461_p8 = scmp.lt.s32.totalorder %s3455_s17, %s3455_s17 }
 0xf09   :  { %v2540_v24 = vpack.c.bf16 %v2538_v3, %v2537_v29 }
 0xf0a   :  { %v2539_v43 = vpack.c.bf16 %v2536_v23, %v2535_v60  ;;  %p3462_p9 = por %p3461_p8, %p3460_p7 }
 0xf0c   :  { %3164 = vmatprep.mubr.msk.bf16.mxu1 %vm2580_vm6, %v2539_v43  ;;  %p3463_p10 = pnand %p3462_p9, %p3456_p6 }
 0xf0d   :  { %3165 = vmatmul.mubr.msk.bf16.vlgmr.msra.gmra.mrb[72].mxu1 %vm2580_vm6, %v2540_v24 }
 0xfe0   :  { %v3166_v49 = vpop.f32.mrb[72].mxu1 }
 0xfe1   :  { %v2621_v31 = vpop.f32.mrb[73].mxu1  ;;  %v2630_v6 = vadd.f32 %v3166_v49, %v2813_v39 }
 0xfe2   :  { %v2622_v38 = vadd.f32 %v2813_v39, %v2621_v31  ;;  %v3167_v40 = vpop.f32.mrb[74].mxu1 }
 0xfe3   :  { %v2624_v44 = vpop.f32.mrb[75].mxu1  ;;  %v2633_v42 = vadd.f32 %v3167_v40, %v2813_v39  ;;  %v2638_v55 = vadd.f32 %v2630_v6, %v4145_v45 }
 0xfe4   :  { %v2625_v47 = vadd.f32 %v2813_v39, %v2624_v44  ;;  %v2636_v50 = vadd.f32 %v2622_v38, %v4138_v32 }
 0xfe5   :  { %v2639_v61 = vadd.f32 %v2633_v42, %v4147_v46  ;;  %v2648_v0 = vsel %vm168_vm0, %v2638_v55, 0.0 }
 0xfe6   :  { %v2642_v54 = vsel %vm168_vm0, %v2636_v50, 0.0  ;;  %v2637_v57 = vadd.f32 %v2625_v47, %v4140_v35 }
 0xfe7   :  { %2643 = vadd.xlane.f32.xlu0 %v2642_v54  ;;  %v2651_v1 = vsel %vm168_vm0, %v2639_v61, 0.0 }
 0xfe8   :  { %v2645_v56 = vsel %vm168_vm0, %v2637_v57, 0.0 }
 0xfe9   :  { %2646 = vadd.xlane.f32.xlu1 %v2645_v56 }
 0xfeb   :  { %2649 = vadd.xlane.f32.xlu0 %v2648_v0 }
 0xfed   :  { %2652 = vadd.xlane.f32.xlu1 %v2651_v1 }
0x1074   :  { %v2644_v12 = vpop.xlane.xlu0 %2643 }
0x1075   :  { %v2654_v32 = vmul.f32 0.03125, %v2644_v12 }
0x1076   :  { %v2647_v2 = vpop.xlane.xlu1 %2646 }
0x1077   :  { %v2658_v8 = vsub.f32 %v2636_v50, %v2654_v32  ;;  %v2655_v4 = vmul.f32 0.03125, %v2647_v2 }
0x1078   :  { %v2650_v35 = vpop.xlane.xlu0 %2649 }
0x1079   :  { %v2659_v5 = vsub.f32 %v2637_v57, %v2655_v4  ;;  %v2656_v45 = vmul.f32 0.03125, %v2650_v35  ;;  %v2662_v37 = vmul.f32 %v2658_v8, %v2658_v8 }
0x107a   :  { %v2653_v7 = vpop.xlane.xlu1 %2652 }
0x107b   :  { %v2660_v41 = vsub.f32 %v2638_v55, %v2656_v45  ;;  %v2657_v9 = vmul.f32 0.03125, %v2653_v7  ;;  %v2666_v46 = vsel %vm168_vm0, %v2662_v37, 0.0  ;;  %v2663_v10 = vmul.f32 %v2659_v5, %v2659_v5 }
0x107c   :  { %2667 = vadd.xlane.f32.xlu0 %v2666_v46 }
0x107d   :  { %v2661_v11 = vsub.f32 %v2639_v61, %v2657_v9  ;;  %v2669_v14 = vsel %vm168_vm0, %v2663_v10, 0.0  ;;  %v2664_v16 = vmul.f32 %v2660_v41, %v2660_v41 }
0x107e   :  { %2670 = vadd.xlane.f32.xlu1 %v2669_v14 }
0x107f   :  { %v2672_v19 = vsel %vm168_vm0, %v2664_v16, 0.0  ;;  %v2665_v62 = vmul.f32 %v2661_v11, %v2661_v11 }
0x1080   :  { %2673 = vadd.xlane.f32.xlu0 %v2672_v19 }
0x1081   :  { %v2675_v20 = vsel %vm168_vm0, %v2665_v62, 0.0 }
0x1082   :  { %2676 = vadd.xlane.f32.xlu1 %v2675_v20 }
0x1109   :  { %v2668_v21 = vpop.xlane.xlu0 %2667 }
0x110a   :  { %v2678_v25 = vmul.f32 0.03125, %v2668_v21 }
0x110b   :  { %v2671_v26 = vpop.xlane.xlu1 %2670 }
0x110c   :  { %v2682_v15 = vadd.f32 1e-12, %v2678_v25  ;;  %v2679_v22 = vmul.f32 0.03125, %v2671_v26 }
0x110d   :  { %v2674_v27 = vpop.xlane.xlu0 %2673 }
0x110e   :  { %3311 = vrsqrt.f32 %v2682_v15  ;;  %v2683_v33 = vadd.f32 1e-12, %v2679_v22  ;;  %v2680_v34 = vmul.f32 0.03125, %v2674_v27 }
0x110f   :  { %v2677_v52 = vpop.xlane.xlu1 %2676 }
0x1110   :  { %3313 = vrsqrt.f32 %v2683_v33  ;;  %v2684_v51 = vadd.f32 1e-12, %v2680_v34  ;;  %v2681_v58 = vmul.f32 0.03125, %v2677_v52 }
0x1112   :  { %3315 = vrsqrt.f32 %v2684_v51  ;;  %v2685_v59 = vadd.f32 1e-12, %v2681_v58 }
0x1114   :  { %3317 = vrsqrt.f32 %v2685_v59 }
0x1118   :  { %v3312_v48 = vpop.eup %3311 }
0x1119   :  { %v2690_v63 = vmul.f32 %v3312_v48, %v2658_v8 }
0x111a   :  { %v3314_v13 = vpop.eup %3313 }
0x111b   :  { %v2700_v17 = vmul.f32 %v2820_v53, %v2690_v63  ;;  %v2691_v18 = vmul.f32 %v3314_v13, %v2659_v5 }
0x111c   :  { %v3316_v30 = vpop.eup %3315 }
0x111d   :  { %v2710_v28 = vadd.f32 %v2821_v36, %v2700_v17  ;;  %v2701_v29 = vmul.f32 %v2820_v53, %v2691_v18  ;;  %v2692_v3 = vmul.f32 %v3316_v30, %v2660_v41 }
0x111e   :  { %v3318_v60 = vpop.eup %3317 }
0x111f   :  { %2714 = vst.msk [vmem:[#allocation13] sm:$0xff] %vm168_vm0, %v2710_v28  ;;  %v2711_v23 = vadd.f32 %v2821_v36, %v2701_v29  ;;  %v2702_v24 = vmul.f32 %v2820_v53, %v2692_v3  ;;  %v2693_v43 = vmul.f32 %v3318_v60, %v2661_v11 }
0x1121   :  { %2715 = vst.msk [vmem:[#allocation13 + $0x8] sm:$0xff] %vm168_vm0, %v2711_v23  ;;  %v2712_v39 = vadd.f32 %v2821_v36, %v2702_v24  ;;  %v2703_v49 = vmul.f32 %v2820_v53, %v2693_v43 }
0x1123   :  { %2716 = vst.msk [vmem:[#allocation13 + $0x10] sm:$0xff] %vm168_vm0, %v2712_v39  ;;  %v2713_v31 = vadd.f32 %v2821_v36, %v2703_v49 }
0x1125   :  { %2717 = vst.msk [vmem:[#allocation13 + $0x18] sm:$0xff] %vm168_vm0, %v2713_v31 }
0x1126   :  { %3466 = shalt.err (!%p3463_p10)
}
0x1127   :  { %s4238_s22 = sld [smem:[#allocation22_spill]] }
0x112d   :  { %s3467_s25 = scalar_lea.hbm %s4238_s22, 512 }
0x112e   :  { %p3468_p11 = scmp.ne.s32.totalorder %s4238_s22, %s3467_s25  ;;  %p3471_p12 = scmp.lt.u32.totalorder %s3467_s25, %s4238_s22 }
0x1130   :  { %p3473_p13 = pnand %p3471_p12, %p3468_p11 }
0x1132   :  { %3476 = shalt.err (!%p3473_p13)
}
0x1133   :  { %s3505_s28 = smov 128  }
0x1134   :  { %2729 = dma.vmem_to_hbm [thread:$0]  %s2724_s16, 512, %s4238_s22, [#allocation4], %s3505_s28, %s3505_s28, %s3502_s29  }
0x1135   :  { %3485 = dma.done.wait [#allocation4], 512  }
0x1136   :  { %3486 = vsyncadd [#allocation4], 4294966784 }
0x1137   :  { %2733 = vsyncpa [#allocation3], 1 }
0x1138   :  { %2734 = vsyncpa [#allocation6], 1 }
0x1139   :  { %2735 = vsyncpa [#allocation9], 1 }
0x113a   :  { %2736 = vsyncpa [#allocation12], 1 }
0x113b   :  { %2737 = vsyncpa [#allocation4], 1 }

</bundles_post_ra>
